<compile_context>
chip_gen: v6e
topology: v6e:2x2x1
jax: 0.10.0
libtpu: 0.0.40
codegen_flags: <defaults>
</compile_context>

<pallas_src>
import functools

import jax
import jax.numpy as jnp
from jax.experimental import pallas as pl
from jax.experimental.pallas import tpu as pltpu


# ----------------------------------------------------------------------------
# Fused kernel: one grid step == one image (full H*W spatial slab in lanes).
# ----------------------------------------------------------------------------
def _c2f_tbafn_kernel(
    x_ref, pmask_ref, w1_ref, b1_ref, wpc_ref,
    wm1a_ref, wm1b_ref, bm1_ref, wm2_ref,
    w2ab_ref, w2c_ref, b2_ref,                 # inputs
    o_ref,                                     # output
    y_scr,                                     # VMEM scratch: cv1 output (2c, HW)
    *, W, HW, c, dc, cdt):
    f32 = jnp.float32

    def silu(z):                     # z is f32 (epilogue stays f32 on all chips)
        # sigmoid via tanh: one EUP op per element (vs exp + reciprocal).
        return z * (0.5 * jnp.tanh(0.5 * z) + 0.5)

    def mm(w, v):                    # MXU matmul, f32 accumulation
        return jnp.dot(w, v.astype(cdt), preferred_element_type=f32)

    # ---- cv1: 1x1 conv (BN scale folded into weights) + SiLU ----------------
    y_scr[...] = silu(mm(w1_ref[...], x_ref[...]) + b1_ref[...]).astype(y_scr.dtype)

    # ---- Partial_conv3 ('split_cat'): 3x3, pad 1, on first dc chans of y1 ---
    # 9 accumulated (dc,dc)@(dc,HW) matmuls over lane-rotated, boundary-masked
    # taps -- no im2col slab in VMEM.
    x1 = y_scr[pl.ds(c, dc), :]                                  # (dc, HW)
    x1c = None
    for kh in range(3):
        for kw in range(3):
            dh, dw = kh - 1, kw - 1
            d = dh * W + dw                                      # flat src offset
            t = kh * 3 + kw
            if d == 0:
                tap = x1
            else:
                # pltpu.roll follows np.roll: out[p] = in[(p - shift) % HW], so
                # shift = -d gives out[p] = in[p + d]; wrapped lanes are masked.
                tap = pltpu.roll(x1, (-d) % HW, 1) * pmask_ref[t]
            contrib = mm(wpc_ref[t], tap)                        # (dc, HW) f32
            x1c = contrib if x1c is None else x1c + contrib

    # ---- MLP: 1x1 (+folded BN) -> ReLU -> 1x1 --------------------------------
    # wm1 is split column-wise (conv(x1) block / untouched block), so the
    # concat x_sm = [conv(x1), x2] never materializes.
    y2 = y_scr[pl.ds(c + dc, c - dc), :]                         # untouched chans
    h = jnp.maximum(mm(wm1a_ref[...], x1c) + mm(wm1b_ref[...], y2) + bm1_ref[...],
                    0.0)                                         # (mh, HW) f32
    # DropPath == identity in eval.  TODO(synk): TBCAM treated as identity.
    tb = mm(wm2_ref[...], h) + y_scr[pl.ds(c, c), :].astype(f32)  # + shortcut y1

    # ---- cv2 over concat(y0, y1, tb): y0,y1 are contiguous rows of y_scr ----
    acc = mm(w2ab_ref[...], y_scr[...]) + mm(w2c_ref[...], tb)
    o_ref[...] = silu(acc + b2_ref[...]).astype(o_ref.dtype)


# ----------------------------------------------------------------------------
# Wrapper: layout plumbing (free reshapes only), BN folding, pallas_call.
# ----------------------------------------------------------------------------
def c2f_tbafn_forward(x_nchw, params, *, compute_dtype=jnp.bfloat16,
                      out_dtype=None):
    B, C1, H, W = x_nchw.shape
    c, c2, mh = params["c"], params["c2"], params["mlp_hidden"]
    dc = c // 4
    assert dc >= 1, "Partial_conv3 needs at least one channel (c >= 4)"
    HW = H * W
    cdt = jnp.dtype(compute_dtype)
    odt = jnp.dtype(x_nchw.dtype) if out_dtype is None else jnp.dtype(out_dtype)
    f32 = jnp.float32

    # Scratch/tap dtype: compute dtype when every y_scr row slice is aligned to
    # the sublane packing of that dtype (bf16 packs rows in pairs), else f32.
    pack = max(1, 4 // cdt.itemsize)
    sdt = cdt if (c % pack == 0 and dc % pack == 0) else jnp.dtype(f32)

    # Fold eval-mode BN scale into the conv weights (bias stays in epilogue).
    w1 = (params["cv1_w"] * params["cv1_scale"][:, None]).astype(cdt)       # (2c, C1)
    b1 = params["cv1_bias"].reshape(2 * c, 1).astype(f32)
    # partial-conv weight (dc, dc, 3, 3) -> (9, dc, dc); leading axis = kh*3+kw
    wpc = jnp.transpose(params["pconv_w"], (2, 3, 0, 1)).reshape(9, dc, dc).astype(cdt)
    wm1 = params["mlp_w1"] * params["mlp_scale"][:, None]                   # (mh, c)
    wm1a = wm1[:, :dc].astype(cdt)                # acts on conv(x1)
    wm1b = wm1[:, dc:].astype(cdt)                # acts on untouched channels
    bm1 = params["mlp_bias"].reshape(mh, 1).astype(f32)
    wm2 = params["mlp_w2"].astype(cdt)                                      # (c, mh)
    w2 = params["cv2_w"] * params["cv2_scale"][:, None]                     # (c2, 3c)
    w2ab = w2[:, :2 * c].astype(cdt)              # acts on [y0; y1] (contiguous)
    w2c = w2[:, 2 * c:].astype(cdt)               # acts on tbafn(y1)
    b2 = params["cv2_bias"].reshape(c2, 1).astype(f32)

    # Boundary (zero-padding) masks for the 9 conv taps, shaped (9, 1, HW) so
    # the kernel indexes the leading (untiled) axis regardless of packing.
    ar = jnp.arange(HW, dtype=jnp.int32)
    ph, pw = ar // W, ar % W
    masks = []
    for kh in range(3):
        for kw in range(3):
            dh, dw = kh - 1, kw - 1
            masks.append((ph + dh >= 0) & (ph + dh < H) &
                         (pw + dw >= 0) & (pw + dw < W))
    pmask = jnp.stack(masks, 0).reshape(9, 1, HW).astype(sdt)

    # NCHW -> channel-major matrix per image: a free reshape, no transpose.
    xm = x_nchw.reshape(B, C1, HW)

    kernel = functools.partial(_c2f_tbafn_kernel,
                               W=W, HW=HW, c=c, dc=dc, cdt=cdt)

    weights = (pmask, w1, b1, wpc, wm1a, wm1b, bm1, wm2, w2ab, w2c, b2)
    wbytes = sum(int(a.size) * a.dtype.itemsize for a in weights)
    in_blk = C1 * HW * xm.dtype.itemsize
    out_blk = c2 * HW * odt.itemsize
    scr_blk = 2 * c * HW * jnp.dtype(sdt).itemsize
    raw_vmem = 2 * (in_blk + out_blk) + 2 * wbytes + scr_blk
    vmem_limit = min(64 * 1024 * 1024,
                     max(32 * 1024 * 1024, int(1.5 * raw_vmem) + (2 << 20)))

    flops = 2 * B * HW * (2 * c * C1 + 9 * dc * dc + mh * c + c * mh + c2 * 3 * c)
    transcendentals = B * HW * (2 * c + c2)          # tanh in the two SiLUs
    bytes_accessed = int(xm.size * xm.dtype.itemsize
                         + B * c2 * HW * odt.itemsize + wbytes)

    def wspec(a):
        if a.ndim == 2:
            return pl.BlockSpec(a.shape, lambda b: (0, 0))
        return pl.BlockSpec(a.shape, lambda b: (0, 0, 0))

    out = pl.pallas_call(
        kernel,
        out_shape=jax.ShapeDtypeStruct((B, c2, HW), odt),
        grid=(B,),
        in_specs=[pl.BlockSpec((None, C1, HW), lambda b: (b, 0, 0))]    # one image
                 + [wspec(a) for a in weights],
        out_specs=pl.BlockSpec((None, c2, HW), lambda b: (b, 0, 0)),
        scratch_shapes=[pltpu.VMEM((2 * c, HW), sdt)],                  # cv1 output
        compiler_params=pltpu.CompilerParams(
            dimension_semantics=("parallel",),        # megacore / v7x 2-TC sharding
            vmem_limit_bytes=vmem_limit),
        cost_estimate=pl.CostEstimate(
            flops=flops, transcendentals=transcendentals,
            bytes_accessed=bytes_accessed),
    )(xm, *weights)

    return out.reshape(B, c2, H, W)


# ----------------------------------------------------------------------------
# Pure-JAX (non-Pallas) f32 reference of the same forward pass.
# ----------------------------------------------------------------------------
def c2f_tbafn_reference(x_nchw, params):
    P = jax.lax.Precision.HIGHEST
    c = params["c"]
    dc = c // 4

    def conv1x1(x, w, scale=None, bias=None, act=None):
        y = jnp.einsum("oi,bihw->bohw", w, x, precision=P)
        if scale is not None:
            y = y * scale[None, :, None, None] + bias[None, :, None, None]
        if act == "silu":
            y = y * jax.nn.sigmoid(y)
        elif act == "relu":
            y = jnp.maximum(y, 0.0)
        return y

    y = conv1x1(x_nchw, params["cv1_w"], params["cv1_scale"],
                params["cv1_bias"], "silu")
    y0, y1 = y[:, :c], y[:, c:]

    # TBAFN (eval): Partial_conv3 -> MLP -> (DropPath = id, TBCAM = id) + shortcut
    x1c = jax.lax.conv_general_dilated(
        y1[:, :dc], params["pconv_w"], window_strides=(1, 1),
        padding=((1, 1), (1, 1)),
        dimension_numbers=("NCHW", "OIHW", "NCHW"), precision=P)
    x_sm = jnp.concatenate([x1c, y1[:, dc:]], axis=1)
    h = conv1x1(x_sm, params["mlp_w1"], params["mlp_scale"],
                params["mlp_bias"], "relu")
    tb = y1 + conv1x1(h, params["mlp_w2"])

    cat = jnp.concatenate([y0, y1, tb], axis=1)
    return conv1x1(cat, params["cv2_w"], params["cv2_scale"],
                   params["cv2_bias"], "silu")


# ----------------------------------------------------------------------------
# Deterministic synthetic parameters (eval-mode BatchNorm as scale/bias).
# ----------------------------------------------------------------------------
def init_params(key, c1, c2, e=0.5, w_scale=0.35):
    c = int(c2 * e)
    dc = c // 4
    assert dc >= 1
    mh = c * 2
    ks = jax.random.split(key, 8)

    def w(k, shape):
        return w_scale * jax.random.normal(k, shape, jnp.float32)

    def bn(k, n):
        k1, k2, k3, k4 = jax.random.split(k, 4)
        gamma = 1.0 + 0.1 * jax.random.normal(k1, (n,), jnp.float32)
        beta = 0.1 * jax.random.normal(k2, (n,), jnp.float32)
        mean = 0.1 * jax.random.normal(k3, (n,), jnp.float32)
        var = 1.0 + 0.1 * jax.random.uniform(k4, (n,), jnp.float32)
        s = gamma / jnp.sqrt(var + 1e-5)
        return s, beta - mean * s

    cv1_s, cv1_b = bn(ks[1], 2 * c)
    mlp_s, mlp_b = bn(ks[4], mh)
    cv2_s, cv2_b = bn(ks[7], c2)
    return dict(
        c=c, c2=c2, mlp_hidden=mh,
        cv1_w=w(ks[0], (2 * c, c1)), cv1_scale=cv1_s, cv1_bias=cv1_b,
        pconv_w=w(ks[2], (dc, dc, 3, 3)),
        mlp_w1=w(ks[3], (mh, c)), mlp_scale=mlp_s, mlp_bias=mlp_b,
        mlp_w2=w(ks[5], (c, mh)),
        cv2_w=w(ks[6], (c2, 3 * c)), cv2_scale=cv2_s, cv2_bias=cv2_b,
    )


# ----------------------------------------------------------------------------
if __name__ == "__main__":
    def run_case(name, B, C1, C2, H, W, seed):
        params = init_params(jax.random.PRNGKey(seed), C1, C2)
        x = jax.random.normal(jax.random.PRNGKey(seed + 1), (B, C1, H, W),
                              jnp.float32)
        ref = c2f_tbafn_reference(x, params)

        # Precise path: f32 MXU inputs + f32 scratch -> tight semantic check.
        out_f32 = jax.block_until_ready(
            c2f_tbafn_forward(x, params, compute_dtype=jnp.float32))
        assert out_f32.shape == ref.shape, (name, out_f32.shape)
        assert jnp.allclose(out_f32, ref, atol=2e-2, rtol=2e-2), \
            f"{name}: f32 fused kernel mismatch vs reference"

        # Fast path (default): bf16 MXU inputs, f32 accumulation/epilogue.
        out_bf16 = jax.block_until_ready(c2f_tbafn_forward(x, params))
        assert out_bf16.shape == ref.shape, (name, out_bf16.shape)
        assert jnp.allclose(out_bf16, ref, atol=8e-2, rtol=8e-2), \
            f"{name}: bf16 fused kernel mismatch vs reference"

    # c = 16, dc = 4: packing-aligned -> exercises the bf16-scratch fast path.
    run_case("c16", B=2, C1=16, C2=32, H=16, W=16, seed=0)
    # c = 4, dc = 1: unaligned slices -> automatic f32-scratch fallback path.
    run_case("c4", B=2, C1=8, C2=8, H=16, W=16, seed=2)

    print("KERNEL_OK")
</pallas_src>

<mosaic_0001>
module attributes {stable_mosaic.version = 11 : i64} {
  func.func @_c2f_tbafn_kernel(%arg0: i32, %arg1: memref<1x16x256xf32, #tpu.memory_space<vmem>>, %arg2: memref<9x1x256xf32, #tpu.memory_space<vmem>>, %arg3: memref<32x16xf32, #tpu.memory_space<vmem>>, %arg4: memref<32x1xf32, #tpu.memory_space<vmem>>, %arg5: memref<9x4x4xf32, #tpu.memory_space<vmem>>, %arg6: memref<32x4xf32, #tpu.memory_space<vmem>>, %arg7: memref<32x12xf32, #tpu.memory_space<vmem>>, %arg8: memref<32x1xf32, #tpu.memory_space<vmem>>, %arg9: memref<16x32xf32, #tpu.memory_space<vmem>>, %arg10: memref<32x32xf32, #tpu.memory_space<vmem>>, %arg11: memref<32x16xf32, #tpu.memory_space<vmem>>, %arg12: memref<32x1xf32, #tpu.memory_space<vmem>>, %arg13: memref<1x32x256xf32, #tpu.memory_space<vmem>>, %arg14: memref<32x256xf32, #tpu.memory_space<vmem>>) attributes {dimension_semantics = [#tpu.dimension_semantics<parallel>], iteration_bounds = array<i64: 2>, scalar_prefetch = 0 : i64, scratch_operands = 1 : i64, tpu.core_type = #tpu.core_type<tc>, window_params = [{transform_indices = @transform_0, window_bounds = array<i64: 1, 16, 256>}, {pipeline_mode = #tpu.pipeline_mode<synchronous>, transform_indices = @transform_1, window_bounds = array<i64: 9, 1, 256>}, {pipeline_mode = #tpu.pipeline_mode<synchronous>, transform_indices = @transform_2, window_bounds = array<i64: 32, 16>}, {pipeline_mode = #tpu.pipeline_mode<synchronous>, transform_indices = @transform_3, window_bounds = array<i64: 32, 1>}, {pipeline_mode = #tpu.pipeline_mode<synchronous>, transform_indices = @transform_4, window_bounds = array<i64: 9, 4, 4>}, {pipeline_mode = #tpu.pipeline_mode<synchronous>, transform_indices = @transform_5, window_bounds = array<i64: 32, 4>}, {pipeline_mode = #tpu.pipeline_mode<synchronous>, transform_indices = @transform_6, window_bounds = array<i64: 32, 12>}, {pipeline_mode = #tpu.pipeline_mode<synchronous>, transform_indices = @transform_7, window_bounds = array<i64: 32, 1>}, {pipeline_mode = #tpu.pipeline_mode<synchronous>, transform_indices = @transform_8, window_bounds = array<i64: 16, 32>}, {pipeline_mode = #tpu.pipeline_mode<synchronous>, transform_indices = @transform_9, window_bounds = array<i64: 32, 32>}, {pipeline_mode = #tpu.pipeline_mode<synchronous>, transform_indices = @transform_10, window_bounds = array<i64: 32, 16>}, {pipeline_mode = #tpu.pipeline_mode<synchronous>, transform_indices = @transform_11, window_bounds = array<i64: 32, 1>}, {transform_indices = @transform_12, window_bounds = array<i64: 1, 32, 256>}]} {
    %c0 = arith.constant 0 : index
    %c0_0 = arith.constant 0 : index
    %0 = vector.load %arg3[%c0, %c0_0] : memref<32x16xf32, #tpu.memory_space<vmem>>, vector<32x16xf32>
    %c0_1 = arith.constant 0 : index
    %c0_2 = arith.constant 0 : index
    %c0_3 = arith.constant 0 : index
    %1 = vector.load %arg1[%c0_1, %c0_2, %c0_3] : memref<1x16x256xf32, #tpu.memory_space<vmem>>, vector<1x16x256xf32>
    %2 = vector.shape_cast %1 : vector<1x16x256xf32> to vector<16x256xf32>
    %cst = arith.constant dense<0.000000e+00> : vector<32x256xf32>
    %3 = tpu.matmul %0, %2, %cst {dimension_numbers = #tpu.dot_dimension_numbers<[1], [0], [0], [1], [0, 0, 1, 1], [], []>} : vector<32x16xf32>, vector<16x256xf32>, vector<32x256xf32> -> vector<32x256xf32>
    %c0_4 = arith.constant 0 : index
    %c0_5 = arith.constant 0 : index
    %4 = vector.load %arg4[%c0_4, %c0_5] : memref<32x1xf32, #tpu.memory_space<vmem>>, vector<32x1xf32>
    %5 = vector.broadcast %4 : vector<32x1xf32> to vector<32x256xf32>
    %6 = arith.addf %3, %5 : vector<32x256xf32>
    %cst_6 = arith.constant 5.000000e-01 : f32
    %7 = vector.broadcast %cst_6 : f32 to vector<32x256xf32>
    %8 = arith.mulf %7, %6 : vector<32x256xf32>
    %9 = math.tanh %8 : vector<32x256xf32>
    %cst_7 = arith.constant 5.000000e-01 : f32
    %10 = vector.broadcast %cst_7 : f32 to vector<32x256xf32>
    %11 = arith.mulf %10, %9 : vector<32x256xf32>
    %cst_8 = arith.constant 5.000000e-01 : f32
    %12 = vector.broadcast %cst_8 : f32 to vector<32x256xf32>
    %13 = arith.addf %11, %12 : vector<32x256xf32>
    %14 = arith.mulf %6, %13 : vector<32x256xf32>
    %c0_9 = arith.constant 0 : index
    %c0_10 = arith.constant 0 : index
    %15 = vector.load %arg14[%c0_9, %c0_10] : memref<32x256xf32, #tpu.memory_space<vmem>>, vector<32x256xf32>
    tpu.vector_store %arg14[%c0_9, %c0_10], %14 {strides = array<i32>} : memref<32x256xf32, #tpu.memory_space<vmem>>, vector<32x256xf32>,
    %c16 = arith.constant 16 : index
    %c0_11 = arith.constant 0 : index
    %16 = vector.load %arg14[%c16, %c0_11] : memref<32x256xf32, #tpu.memory_space<vmem>>, vector<4x256xf32>
    %c17_i32 = arith.constant 17 : i32
    %17 = tpu.dynamic_rotate %16 by %c17_i32 dim 1 : vector<4x256xf32>, i32 -> vector<4x256xf32>
    %c0_12 = arith.constant 0 : index
    %c0_13 = arith.constant 0 : index
    %c0_14 = arith.constant 0 : index
    %18 = vector.load %arg2[%c0_12, %c0_13, %c0_14] : memref<9x1x256xf32, #tpu.memory_space<vmem>>, vector<1x1x256xf32>
    %19 = vector.shape_cast %18 : vector<1x1x256xf32> to vector<1x256xf32>
    %20 = vector.broadcast %19 : vector<1x256xf32> to vector<4x256xf32>
    %21 = arith.mulf %17, %20 : vector<4x256xf32>
    %c0_15 = arith.constant 0 : index
    %c0_16 = arith.constant 0 : index
    %c0_17 = arith.constant 0 : index
    %22 = vector.load %arg5[%c0_15, %c0_16, %c0_17] : memref<9x4x4xf32, #tpu.memory_space<vmem>>, vector<1x4x4xf32>
    %23 = vector.shape_cast %22 : vector<1x4x4xf32> to vector<4x4xf32>
    %cst_18 = arith.constant dense<0.000000e+00> : vector<4x256xf32>
    %24 = tpu.matmul %23, %21, %cst_18 {dimension_numbers = #tpu.dot_dimension_numbers<[1], [0], [0], [1], [0, 0, 1, 1], [], []>} : vector<4x4xf32>, vector<4x256xf32>, vector<4x256xf32> -> vector<4x256xf32>
    %c16_i32 = arith.constant 16 : i32
    %25 = tpu.dynamic_rotate %16 by %c16_i32 dim 1 : vector<4x256xf32>, i32 -> vector<4x256xf32>
    %c1 = arith.constant 1 : index
    %c0_19 = arith.constant 0 : index
    %c0_20 = arith.constant 0 : index
    %26 = vector.load %arg2[%c1, %c0_19, %c0_20] : memref<9x1x256xf32, #tpu.memory_space<vmem>>, vector<1x1x256xf32>
    %27 = vector.shape_cast %26 : vector<1x1x256xf32> to vector<1x256xf32>
    %28 = vector.broadcast %27 : vector<1x256xf32> to vector<4x256xf32>
    %29 = arith.mulf %25, %28 : vector<4x256xf32>
    %c1_21 = arith.constant 1 : index
    %c0_22 = arith.constant 0 : index
    %c0_23 = arith.constant 0 : index
    %30 = vector.load %arg5[%c1_21, %c0_22, %c0_23] : memref<9x4x4xf32, #tpu.memory_space<vmem>>, vector<1x4x4xf32>
    %31 = vector.shape_cast %30 : vector<1x4x4xf32> to vector<4x4xf32>
    %cst_24 = arith.constant dense<0.000000e+00> : vector<4x256xf32>
    %32 = tpu.matmul %31, %29, %cst_24 {dimension_numbers = #tpu.dot_dimension_numbers<[1], [0], [0], [1], [0, 0, 1, 1], [], []>} : vector<4x4xf32>, vector<4x256xf32>, vector<4x256xf32> -> vector<4x256xf32>
    %33 = arith.addf %24, %32 : vector<4x256xf32>
    %c15_i32 = arith.constant 15 : i32
    %34 = tpu.dynamic_rotate %16 by %c15_i32 dim 1 : vector<4x256xf32>, i32 -> vector<4x256xf32>
    %c2 = arith.constant 2 : index
    %c0_25 = arith.constant 0 : index
    %c0_26 = arith.constant 0 : index
    %35 = vector.load %arg2[%c2, %c0_25, %c0_26] : memref<9x1x256xf32, #tpu.memory_space<vmem>>, vector<1x1x256xf32>
    %36 = vector.shape_cast %35 : vector<1x1x256xf32> to vector<1x256xf32>
    %37 = vector.broadcast %36 : vector<1x256xf32> to vector<4x256xf32>
    %38 = arith.mulf %34, %37 : vector<4x256xf32>
    %c2_27 = arith.constant 2 : index
    %c0_28 = arith.constant 0 : index
    %c0_29 = arith.constant 0 : index
    %39 = vector.load %arg5[%c2_27, %c0_28, %c0_29] : memref<9x4x4xf32, #tpu.memory_space<vmem>>, vector<1x4x4xf32>
    %40 = vector.shape_cast %39 : vector<1x4x4xf32> to vector<4x4xf32>
    %cst_30 = arith.constant dense<0.000000e+00> : vector<4x256xf32>
    %41 = tpu.matmul %40, %38, %cst_30 {dimension_numbers = #tpu.dot_dimension_numbers<[1], [0], [0], [1], [0, 0, 1, 1], [], []>} : vector<4x4xf32>, vector<4x256xf32>, vector<4x256xf32> -> vector<4x256xf32>
    %42 = arith.addf %33, %41 : vector<4x256xf32>
    %c1_i32 = arith.constant 1 : i32
    %43 = tpu.dynamic_rotate %16 by %c1_i32 dim 1 : vector<4x256xf32>, i32 -> vector<4x256xf32>
    %c3 = arith.constant 3 : index
    %c0_31 = arith.constant 0 : index
    %c0_32 = arith.constant 0 : index
    %44 = vector.load %arg2[%c3, %c0_31, %c0_32] : memref<9x1x256xf32, #tpu.memory_space<vmem>>, vector<1x1x256xf32>
    %45 = vector.shape_cast %44 : vector<1x1x256xf32> to vector<1x256xf32>
    %46 = vector.broadcast %45 : vector<1x256xf32> to vector<4x256xf32>
    %47 = arith.mulf %43, %46 : vector<4x256xf32>
    %c3_33 = arith.constant 3 : index
    %c0_34 = arith.constant 0 : index
    %c0_35 = arith.constant 0 : index
    %48 = vector.load %arg5[%c3_33, %c0_34, %c0_35] : memref<9x4x4xf32, #tpu.memory_space<vmem>>, vector<1x4x4xf32>
    %49 = vector.shape_cast %48 : vector<1x4x4xf32> to vector<4x4xf32>
    %cst_36 = arith.constant dense<0.000000e+00> : vector<4x256xf32>
    %50 = tpu.matmul %49, %47, %cst_36 {dimension_numbers = #tpu.dot_dimension_numbers<[1], [0], [0], [1], [0, 0, 1, 1], [], []>} : vector<4x4xf32>, vector<4x256xf32>, vector<4x256xf32> -> vector<4x256xf32>
    %51 = arith.addf %42, %50 : vector<4x256xf32>
    %c4 = arith.constant 4 : index
    %c0_37 = arith.constant 0 : index
    %c0_38 = arith.constant 0 : index
    %52 = vector.load %arg5[%c4, %c0_37, %c0_38] : memref<9x4x4xf32, #tpu.memory_space<vmem>>, vector<1x4x4xf32>
    %53 = vector.shape_cast %52 : vector<1x4x4xf32> to vector<4x4xf32>
    %cst_39 = arith.constant dense<0.000000e+00> : vector<4x256xf32>
    %54 = tpu.matmul %53, %16, %cst_39 {dimension_numbers = #tpu.dot_dimension_numbers<[1], [0], [0], [1], [0, 0, 1, 1], [], []>} : vector<4x4xf32>, vector<4x256xf32>, vector<4x256xf32> -> vector<4x256xf32>
    %55 = arith.addf %51, %54 : vector<4x256xf32>
    %c255_i32 = arith.constant 255 : i32
    %56 = tpu.dynamic_rotate %16 by %c255_i32 dim 1 : vector<4x256xf32>, i32 -> vector<4x256xf32>
    %c5 = arith.constant 5 : index
    %c0_40 = arith.constant 0 : index
    %c0_41 = arith.constant 0 : index
    %57 = vector.load %arg2[%c5, %c0_40, %c0_41] : memref<9x1x256xf32, #tpu.memory_space<vmem>>, vector<1x1x256xf32>
    %58 = vector.shape_cast %57 : vector<1x1x256xf32> to vector<1x256xf32>
    %59 = vector.broadcast %58 : vector<1x256xf32> to vector<4x256xf32>
    %60 = arith.mulf %56, %59 : vector<4x256xf32>
    %c5_42 = arith.constant 5 : index
    %c0_43 = arith.constant 0 : index
    %c0_44 = arith.constant 0 : index
    %61 = vector.load %arg5[%c5_42, %c0_43, %c0_44] : memref<9x4x4xf32, #tpu.memory_space<vmem>>, vector<1x4x4xf32>
    %62 = vector.shape_cast %61 : vector<1x4x4xf32> to vector<4x4xf32>
    %cst_45 = arith.constant dense<0.000000e+00> : vector<4x256xf32>
    %63 = tpu.matmul %62, %60, %cst_45 {dimension_numbers = #tpu.dot_dimension_numbers<[1], [0], [0], [1], [0, 0, 1, 1], [], []>} : vector<4x4xf32>, vector<4x256xf32>, vector<4x256xf32> -> vector<4x256xf32>
    %64 = arith.addf %55, %63 : vector<4x256xf32>
    %c241_i32 = arith.constant 241 : i32
    %65 = tpu.dynamic_rotate %16 by %c241_i32 dim 1 : vector<4x256xf32>, i32 -> vector<4x256xf32>
    %c6 = arith.constant 6 : index
    %c0_46 = arith.constant 0 : index
    %c0_47 = arith.constant 0 : index
    %66 = vector.load %arg2[%c6, %c0_46, %c0_47] : memref<9x1x256xf32, #tpu.memory_space<vmem>>, vector<1x1x256xf32>
    %67 = vector.shape_cast %66 : vector<1x1x256xf32> to vector<1x256xf32>
    %68 = vector.broadcast %67 : vector<1x256xf32> to vector<4x256xf32>
    %69 = arith.mulf %65, %68 : vector<4x256xf32>
    %c6_48 = arith.constant 6 : index
    %c0_49 = arith.constant 0 : index
    %c0_50 = arith.constant 0 : index
    %70 = vector.load %arg5[%c6_48, %c0_49, %c0_50] : memref<9x4x4xf32, #tpu.memory_space<vmem>>, vector<1x4x4xf32>
    %71 = vector.shape_cast %70 : vector<1x4x4xf32> to vector<4x4xf32>
    %cst_51 = arith.constant dense<0.000000e+00> : vector<4x256xf32>
    %72 = tpu.matmul %71, %69, %cst_51 {dimension_numbers = #tpu.dot_dimension_numbers<[1], [0], [0], [1], [0, 0, 1, 1], [], []>} : vector<4x4xf32>, vector<4x256xf32>, vector<4x256xf32> -> vector<4x256xf32>
    %73 = arith.addf %64, %72 : vector<4x256xf32>
    %c240_i32 = arith.constant 240 : i32
    %74 = tpu.dynamic_rotate %16 by %c240_i32 dim 1 : vector<4x256xf32>, i32 -> vector<4x256xf32>
    %c7 = arith.constant 7 : index
    %c0_52 = arith.constant 0 : index
    %c0_53 = arith.constant 0 : index
    %75 = vector.load %arg2[%c7, %c0_52, %c0_53] : memref<9x1x256xf32, #tpu.memory_space<vmem>>, vector<1x1x256xf32>
    %76 = vector.shape_cast %75 : vector<1x1x256xf32> to vector<1x256xf32>
    %77 = vector.broadcast %76 : vector<1x256xf32> to vector<4x256xf32>
    %78 = arith.mulf %74, %77 : vector<4x256xf32>
    %c7_54 = arith.constant 7 : index
    %c0_55 = arith.constant 0 : index
    %c0_56 = arith.constant 0 : index
    %79 = vector.load %arg5[%c7_54, %c0_55, %c0_56] : memref<9x4x4xf32, #tpu.memory_space<vmem>>, vector<1x4x4xf32>
    %80 = vector.shape_cast %79 : vector<1x4x4xf32> to vector<4x4xf32>
    %cst_57 = arith.constant dense<0.000000e+00> : vector<4x256xf32>
    %81 = tpu.matmul %80, %78, %cst_57 {dimension_numbers = #tpu.dot_dimension_numbers<[1], [0], [0], [1], [0, 0, 1, 1], [], []>} : vector<4x4xf32>, vector<4x256xf32>, vector<4x256xf32> -> vector<4x256xf32>
    %82 = arith.addf %73, %81 : vector<4x256xf32>
    %c239_i32 = arith.constant 239 : i32
    %83 = tpu.dynamic_rotate %16 by %c239_i32 dim 1 : vector<4x256xf32>, i32 -> vector<4x256xf32>
    %c8 = arith.constant 8 : index
    %c0_58 = arith.constant 0 : index
    %c0_59 = arith.constant 0 : index
    %84 = vector.load %arg2[%c8, %c0_58, %c0_59] : memref<9x1x256xf32, #tpu.memory_space<vmem>>, vector<1x1x256xf32>
    %85 = vector.shape_cast %84 : vector<1x1x256xf32> to vector<1x256xf32>
    %86 = vector.broadcast %85 : vector<1x256xf32> to vector<4x256xf32>
    %87 = arith.mulf %83, %86 : vector<4x256xf32>
    %c8_60 = arith.constant 8 : index
    %c0_61 = arith.constant 0 : index
    %c0_62 = arith.constant 0 : index
    %88 = vector.load %arg5[%c8_60, %c0_61, %c0_62] : memref<9x4x4xf32, #tpu.memory_space<vmem>>, vector<1x4x4xf32>
    %89 = vector.shape_cast %88 : vector<1x4x4xf32> to vector<4x4xf32>
    %cst_63 = arith.constant dense<0.000000e+00> : vector<4x256xf32>
    %90 = tpu.matmul %89, %87, %cst_63 {dimension_numbers = #tpu.dot_dimension_numbers<[1], [0], [0], [1], [0, 0, 1, 1], [], []>} : vector<4x4xf32>, vector<4x256xf32>, vector<4x256xf32> -> vector<4x256xf32>
    %91 = arith.addf %82, %90 : vector<4x256xf32>
    %c20 = arith.constant 20 : index
    %c0_64 = arith.constant 0 : index
    %92 = vector.load %arg14[%c20, %c0_64] : memref<32x256xf32, #tpu.memory_space<vmem>>, vector<12x256xf32>
    %c0_65 = arith.constant 0 : index
    %c0_66 = arith.constant 0 : index
    %93 = vector.load %arg6[%c0_65, %c0_66] : memref<32x4xf32, #tpu.memory_space<vmem>>, vector<32x4xf32>
    %cst_67 = arith.constant dense<0.000000e+00> : vector<32x256xf32>
    %94 = tpu.matmul %93, %91, %cst_67 {dimension_numbers = #tpu.dot_dimension_numbers<[1], [0], [0], [1], [0, 0, 1, 1], [], []>} : vector<32x4xf32>, vector<4x256xf32>, vector<32x256xf32> -> vector<32x256xf32>
    %c0_68 = arith.constant 0 : index
    %c0_69 = arith.constant 0 : index
    %95 = vector.load %arg7[%c0_68, %c0_69] : memref<32x12xf32, #tpu.memory_space<vmem>>, vector<32x12xf32>
    %cst_70 = arith.constant dense<0.000000e+00> : vector<32x256xf32>
    %96 = tpu.matmul %95, %92, %cst_70 {dimension_numbers = #tpu.dot_dimension_numbers<[1], [0], [0], [1], [0, 0, 1, 1], [], []>} : vector<32x12xf32>, vector<12x256xf32>, vector<32x256xf32> -> vector<32x256xf32>
    %97 = arith.addf %94, %96 : vector<32x256xf32>
    %c0_71 = arith.constant 0 : index
    %c0_72 = arith.constant 0 : index
    %98 = vector.load %arg8[%c0_71, %c0_72] : memref<32x1xf32, #tpu.memory_space<vmem>>, vector<32x1xf32>
    %99 = vector.broadcast %98 : vector<32x1xf32> to vector<32x256xf32>
    %100 = arith.addf %97, %99 : vector<32x256xf32>
    %cst_73 = arith.constant 0.000000e+00 : f32
    %101 = vector.broadcast %cst_73 : f32 to vector<32x256xf32>
    %102 = arith.maximumf %100, %101 : vector<32x256xf32>
    %c0_74 = arith.constant 0 : index
    %c0_75 = arith.constant 0 : index
    %103 = vector.load %arg9[%c0_74, %c0_75] : memref<16x32xf32, #tpu.memory_space<vmem>>, vector<16x32xf32>
    %cst_76 = arith.constant dense<0.000000e+00> : vector<16x256xf32>
    %104 = tpu.matmul %103, %102, %cst_76 {dimension_numbers = #tpu.dot_dimension_numbers<[1], [0], [0], [1], [0, 0, 1, 1], [], []>} : vector<16x32xf32>, vector<32x256xf32>, vector<16x256xf32> -> vector<16x256xf32>
    %c16_77 = arith.constant 16 : index
    %c0_78 = arith.constant 0 : index
    %105 = vector.load %arg14[%c16_77, %c0_78] : memref<32x256xf32, #tpu.memory_space<vmem>>, vector<16x256xf32>
    %106 = arith.addf %104, %105 : vector<16x256xf32>
    %c0_79 = arith.constant 0 : index
    %c0_80 = arith.constant 0 : index
    %107 = vector.load %arg10[%c0_79, %c0_80] : memref<32x32xf32, #tpu.memory_space<vmem>>, vector<32x32xf32>
    %c0_81 = arith.constant 0 : index
    %c0_82 = arith.constant 0 : index
    %108 = vector.load %arg14[%c0_81, %c0_82] : memref<32x256xf32, #tpu.memory_space<vmem>>, vector<32x256xf32>
    %cst_83 = arith.constant dense<0.000000e+00> : vector<32x256xf32>
    %109 = tpu.matmul %107, %108, %cst_83 {dimension_numbers = #tpu.dot_dimension_numbers<[1], [0], [0], [1], [0, 0, 1, 1], [], []>} : vector<32x32xf32>, vector<32x256xf32>, vector<32x256xf32> -> vector<32x256xf32>
    %c0_84 = arith.constant 0 : index
    %c0_85 = arith.constant 0 : index
    %110 = vector.load %arg11[%c0_84, %c0_85] : memref<32x16xf32, #tpu.memory_space<vmem>>, vector<32x16xf32>
    %cst_86 = arith.constant dense<0.000000e+00> : vector<32x256xf32>
    %111 = tpu.matmul %110, %106, %cst_86 {dimension_numbers = #tpu.dot_dimension_numbers<[1], [0], [0], [1], [0, 0, 1, 1], [], []>} : vector<32x16xf32>, vector<16x256xf32>, vector<32x256xf32> -> vector<32x256xf32>
    %112 = arith.addf %109, %111 : vector<32x256xf32>
    %c0_87 = arith.constant 0 : index
    %c0_88 = arith.constant 0 : index
    %113 = vector.load %arg12[%c0_87, %c0_88] : memref<32x1xf32, #tpu.memory_space<vmem>>, vector<32x1xf32>
    %114 = vector.broadcast %113 : vector<32x1xf32> to vector<32x256xf32>
    %115 = arith.addf %112, %114 : vector<32x256xf32>
    %cst_89 = arith.constant 5.000000e-01 : f32
    %116 = vector.broadcast %cst_89 : f32 to vector<32x256xf32>
    %117 = arith.mulf %116, %115 : vector<32x256xf32>
    %118 = math.tanh %117 : vector<32x256xf32>
    %cst_90 = arith.constant 5.000000e-01 : f32
    %119 = vector.broadcast %cst_90 : f32 to vector<32x256xf32>
    %120 = arith.mulf %119, %118 : vector<32x256xf32>
    %cst_91 = arith.constant 5.000000e-01 : f32
    %121 = vector.broadcast %cst_91 : f32 to vector<32x256xf32>
    %122 = arith.addf %120, %121 : vector<32x256xf32>
    %123 = arith.mulf %115, %122 : vector<32x256xf32>
    %c0_92 = arith.constant 0 : index
    %c0_93 = arith.constant 0 : index
    %c0_94 = arith.constant 0 : index
    %124 = vector.load %arg13[%c0_92, %c0_93, %c0_94] : memref<1x32x256xf32, #tpu.memory_space<vmem>>, vector<1x32x256xf32>
    %125 = vector.shape_cast %124 : vector<1x32x256xf32> to vector<32x256xf32>
    %126 = vector.shape_cast %123 : vector<32x256xf32> to vector<1x32x256xf32>
    tpu.vector_store %arg13[%c0_92, %c0_93, %c0_94], %126 {strides = array<i32>} : memref<1x32x256xf32, #tpu.memory_space<vmem>>, vector<1x32x256xf32>,
    return
  }
  func.func @transform_0(%arg0: i32) -> (i32, i32, i32) {
    %c0_i32 = arith.constant 0 : i32
    %c0_i32_0 = arith.constant 0 : i32
    %c0_i32_1 = arith.constant 0 : i32
    return %arg0, %c0_i32, %c0_i32_0 : i32, i32, i32
  }
  func.func @transform_1(%arg0: i32) -> (i32, i32, i32) {
    %c0_i32 = arith.constant 0 : i32
    %c0_i32_0 = arith.constant 0 : i32
    %c0_i32_1 = arith.constant 0 : i32
    %c0_i32_2 = arith.constant 0 : i32
    return %c0_i32, %c0_i32_0, %c0_i32_1 : i32, i32, i32
  }
  func.func @transform_2(%arg0: i32) -> (i32, i32) {
    %c0_i32 = arith.constant 0 : i32
    %c0_i32_0 = arith.constant 0 : i32
    %c0_i32_1 = arith.constant 0 : i32
    return %c0_i32, %c0_i32_0 : i32, i32
  }
  func.func @transform_3(%arg0: i32) -> (i32, i32) {
    %c0_i32 = arith.constant 0 : i32
    %c0_i32_0 = arith.constant 0 : i32
    %c0_i32_1 = arith.constant 0 : i32
    return %c0_i32, %c0_i32_0 : i32, i32
  }
  func.func @transform_4(%arg0: i32) -> (i32, i32, i32) {
    %c0_i32 = arith.constant 0 : i32
    %c0_i32_0 = arith.constant 0 : i32
    %c0_i32_1 = arith.constant 0 : i32
    %c0_i32_2 = arith.constant 0 : i32
    return %c0_i32, %c0_i32_0, %c0_i32_1 : i32, i32, i32
  }
  func.func @transform_5(%arg0: i32) -> (i32, i32) {
    %c0_i32 = arith.constant 0 : i32
    %c0_i32_0 = arith.constant 0 : i32
    %c0_i32_1 = arith.constant 0 : i32
    return %c0_i32, %c0_i32_0 : i32, i32
  }
  func.func @transform_6(%arg0: i32) -> (i32, i32) {
    %c0_i32 = arith.constant 0 : i32
    %c0_i32_0 = arith.constant 0 : i32
    %c0_i32_1 = arith.constant 0 : i32
    return %c0_i32, %c0_i32_0 : i32, i32
  }
  func.func @transform_7(%arg0: i32) -> (i32, i32) {
    %c0_i32 = arith.constant 0 : i32
    %c0_i32_0 = arith.constant 0 : i32
    %c0_i32_1 = arith.constant 0 : i32
    return %c0_i32, %c0_i32_0 : i32, i32
  }
  func.func @transform_8(%arg0: i32) -> (i32, i32) {
    %c0_i32 = arith.constant 0 : i32
    %c0_i32_0 = arith.constant 0 : i32
    %c0_i32_1 = arith.constant 0 : i32
    return %c0_i32, %c0_i32_0 : i32, i32
  }
  func.func @transform_9(%arg0: i32) -> (i32, i32) {
    %c0_i32 = arith.constant 0 : i32
    %c0_i32_0 = arith.constant 0 : i32
    %c0_i32_1 = arith.constant 0 : i32
    return %c0_i32, %c0_i32_0 : i32, i32
  }
  func.func @transform_10(%arg0: i32) -> (i32, i32) {
    %c0_i32 = arith.constant 0 : i32
    %c0_i32_0 = arith.constant 0 : i32
    %c0_i32_1 = arith.constant 0 : i32
    return %c0_i32, %c0_i32_0 : i32, i32
  }
  func.func @transform_11(%arg0: i32) -> (i32, i32) {
    %c0_i32 = arith.constant 0 : i32
    %c0_i32_0 = arith.constant 0 : i32
    %c0_i32_1 = arith.constant 0 : i32
    return %c0_i32, %c0_i32_0 : i32, i32
  }
  func.func @transform_12(%arg0: i32) -> (i32, i32, i32) {
    %c0_i32 = arith.constant 0 : i32
    %c0_i32_0 = arith.constant 0 : i32
    %c0_i32_1 = arith.constant 0 : i32
    return %arg0, %c0_i32, %c0_i32_0 : i32, i32, i32
  }
}

</mosaic_0001>

<bundles_post_ra>
// kernel: tpu_custom_call.1
= control target key start
LH: loop header
LB: loop body
LE: loop exit
PB: predicated region body
PF: predicated region fallthrough
CT: control target
= control target key end

     0   :  { %s3033_s0 = inlined_call_operand.vmem [shape: f32[2,16,256], index: 0, kind: input, shape index: {}]   ;;  %s3034_s1 = inlined_call_operand.vmem [shape: f32[9,1,256], index: 1, kind: input, shape index: {}]   ;;  %s3035_s2 = inlined_call_operand.vmem [shape: f32[32,16], index: 2, kind: input, shape index: {}]   ;;  %s3036_s3 = inlined_call_operand.vmem [shape: f32[32,1], index: 3, kind: input, shape index: {}]   ;;  %s3037_s4 = inlined_call_operand.vmem [shape: f32[9,4,4], index: 4, kind: input, shape index: {}]   ;;  %s3038_s5 = inlined_call_operand.vmem [shape: f32[32,4], index: 5, kind: input, shape index: {}]   ;;  %s3039_s6 = inlined_call_operand.vmem [shape: f32[32,12], index: 6, kind: input, shape index: {}]   ;;  %s3040_s7 = inlined_call_operand.vmem [shape: f32[32,1], index: 7, kind: input, shape index: {}]   ;;  %s3041_s8 = inlined_call_operand.vmem [shape: f32[16,32], index: 8, kind: input, shape index: {}]   ;;  %s3042_s9 = inlined_call_operand.vmem [shape: f32[32,32], index: 9, kind: input, shape index: {}]   ;;  %s3043_s10 = inlined_call_operand.vmem [shape: f32[32,16], index: 10, kind: input, shape index: {}]   ;;  %s3044_s11 = inlined_call_operand.vmem [shape: f32[32,1], index: 11, kind: input, shape index: {}]   ;;  %s3045_s12 = inlined_call_operand.hbm [shape: f32[2,32,256], index: 12, kind: output, shape index: {}]  }
   0x1   :  { %3047 = sst [smem:[#allocation6_spill]] %s3033_s0 }
   0x2   :  { %3048 = sst [smem:[#allocation7_spill]] %s3034_s1 }
   0x3   :  { %17 = vsyncpa [#allocation4], 0 }
   0x4   :  { %19 = vsyncpa [#allocation4 + $0x1], 0  ;;  %s2566_s21 = smov 0   ;;  %s2568_s22 = smov 0  }
   0x5   :  { %s2570_s23 = smov 0   ;;  %s2572_s24 = smov 0  }
   0x6 LB: > { %s2587_s25 = sadd.s32 4294967295, %s2487_s24   ;;  %s2261_s26 = sadd.s32 4294967294, %s2487_s24   ;;  %s2487_s24 = sphi %s2572_s24, %s3057_s24   ;;  %s2483_s23 = sphi %s2570_s23, %s3056_s23   ;;  %s2479_s22 = sphi %s2568_s22, %s3055_s22   ;;  %s2475_s21 = sphi %s2566_s21, %s3054_s21  }
   0x7   : > { %s2591_s27 = sadd.s32 1, %s2487_s24   ;;  %s289_s28 = sadd.s32 1, %s2483_s23 }
   0x8   : > { %s286_s29 = ssub.s32 %s2487_s24, %s2591_s27  ;;  %p299_p0 = scmp.ne.s32.totalorder %s2483_s23, %s2479_s22 }
   0x9   : > { %p287_p1 = scmp.eq.s32.totalorder %s286_s29, 0  ;;  %p300_p2 = scmp.eq.s32.totalorder %s2587_s25, 1 }
   0xa   : > { %p305_p3 = scmp.ne.s32.totalorder %s2479_s22, %s2475_s21  ;;  %p306_p4 = scmp.eq.s32.totalorder %s2261_s26, 1 }
   0xb   : > { %s2602_s30 = scalar_select %p287_p1, %s2483_s23, %s289_s28  }
   0xc   : > { %p2604_p5 = por %p300_p2, %p299_p0  ;;  %p2608_p6 = por %p306_p4, %p305_p3 }
   0xd   : > { %p2264_p7 = scmp.ge.s32.totalorder %s2487_s24, 1  ;;  %p365_p8 = scmp.lt.s32.totalorder %s2487_s24, 3 }
   0xf   : > { %p366_p9 = pnand %p2264_p7, %p365_p8 }
  0x10   : > { %p407_p10 = scmp.lt.s32.totalorder (!%p366_p9), %s2587_s25, 1  ;;  %s3051_s0 = sld [smem:[#allocation6_spill]] (!%p366_p9) }
  0x11   : > { %369 = sbr.rel (%p366_p9) target bundleno = 1286 (0x506), region = 68  ;;  %s2492_s28 = smov (!%p366_p9), 17  }
  0x12   : > { %s2493_s29 = smov (!%p366_p9), 15   ;;  %s2494_s15 = smov (!%p366_p9), 1  }
  0x13   : > { %s2495_s16 = smov (!%p366_p9), 127   ;;  %s2498_s19 = smov (!%p366_p9), 111  }
  0x14   : > { %s3052_s1 = sld [smem:[#allocation7_spill]] (!%p366_p9) }
  0x16   : > { %v2489_v0 = vmov 0.0   ;;  %v422_v1 = vld [vmem:[%s3036_s3 + $0x10] sm:$0xff]  ;;  %s408_s17 = scalar_select %p407_p10, %s2587_s25, 1  ;;  %v2490_v2 = vmov 0   ;;  %v412_v7 = vld [vmem:[%s3035_s2] sm:$0xff]  ;;  %vm444_vm0 = vcmask 130048   ;;  %v600_v43 = vlaneseq }
  0x17   : > { %521 = vmatprep.mubr.f32.mxu0 %v2489_v0  ;;  %719 = vmatprep.mubr.f32.mxu1 %v2489_v0  ;;  %v413_v8 = vld [vmem:[%s3035_s2 + $0x8] sm:$0xff]  ;;  %v414_v9 = vld [vmem:[%s3035_s2 + $0x10] sm:$0xff]  ;;  %v415_v10 = vld [vmem:[%s3035_s2 + $0x18] sm:$0xff]  ;;  %vm648_vm3 = vcmask 1043456   ;;  %vm644_vm4 = vcmask 31744   ;;  %vm1550_vm11 = vcmask 97280  }
  0x18   : > { %2393 = vset.pattern.permute.xlu0 %v2490_v2  ;;  %2394 = vset.pattern.permute.xlu1 %v2490_v2  ;;  %s2341_s18 = sshll.u32 %s408_s17, 5  ;;  %s2496_s17 = smov 113   ;;  %v1766_v32 = vld [vmem:[%s3040_s7 + $0x18] sm:$0xff]  ;;  %v1764_v34 = vld [vmem:[%s3040_s7 + $0x8] sm:$0xff]  ;;  %v1765_v35 = vld [vmem:[%s3040_s7 + $0x10] sm:$0xff]  ;;  %v608_v44 = vshrl.u32 %v600_v43, 7 }
  0x19   : > { %436 = vperm.xlu0 %2393, %v422_v1   ;;  %s411_s26 = scalar_lea.vmem %s3051_s0, %s2341_s18  ;;  %s2497_s18 = smov 112   ;;  %v423_v33 = vld [vmem:[%s3036_s3 + $0x18] sm:$0xff]  ;;  %v421_v36 = vld [vmem:[%s3036_s3 + $0x8] sm:$0xff]  ;;  %v1763_v37 = vld [vmem:[%s3040_s7] sm:$0xff]  ;;  %v2713_v45 = vand.u32 127, %v600_v43  ;;  %vm1807_vm12 = vcmask 261120  }
  0x1a   : > { %v419_v3 = vld [vmem:[%s411_s26 + $0x18] sm:$0xff]  ;;  %v418_v4 = vld [vmem:[%s411_s26 + $0x10] sm:$0xff]  ;;  %v417_v5 = vld [vmem:[%s411_s26 + $0x8] sm:$0xff]  ;;  %v2715_v46 = vsub.s32 0, %v608_v44  ;;  %v2717_v47 = vsub.s32 1, %v608_v44 }
  0x1b   : > { %485 = vmatprep.subr.mxu0 %v419_v3  ;;  %v416_v6 = vld [vmem:[%s411_s26] sm:$0xff]  ;;  %s3046_s26 = smov 16   ;;  %v2107_v40 = vld [vmem:[%s3044_s11 + $0x10] sm:$0xff]  ;;  %v2106_v41 = vld [vmem:[%s3044_s11 + $0x8] sm:$0xff]  ;;  %vm624_vm1 = vcmp.lt.s32.totalorder %v2713_v45, 16  ;;  %vm602_vm2 = vcmp.lt.s32.totalorder %v2713_v45, 17 }
  0x1c   : > { %486 = vmatpush1.msra.mxu0 %v418_v4  ;;  %v2105_v38 = vld [vmem:[%s3044_s11] sm:$0xff]  ;;  %v2108_v42 = vld [vmem:[%s3044_s11 + $0x18] sm:$0xff]  ;;  %vm810_vm5 = vcmp.lt.s32.totalorder %v2713_v45, 15  ;;  %vm916_vm6 = vcmp.lt.s32.totalorder %v2713_v45, 1  ;;  %vm1106_vm7 = vcmp.lt.s32.totalorder %v2713_v45, 127  ;;  %vm1212_vm8 = vcmp.lt.s32.totalorder %v2713_v45, 113 }
  0x1d   : > { %487 = vmatprep.subr.mxu0 %v417_v5  ;;  %v420_v39 = vld [vmem:[%s3036_s3] sm:$0xff]  ;;  %v2290_v44 = vld [vmem:[%s3037_s4 + $0x10] sm:$0xf]  ;;  %vm1318_vm9 = vcmp.lt.s32.totalorder %v2713_v45, 112  ;;  %vm1424_vm10 = vcmp.lt.s32.totalorder %v2713_v45, 111 }
  0x1e   : > { %488 = vmatpush1.msra.mxu0 %v416_v6  ;;  %v2272_v48 = vld [vmem:[%s3052_s1 + $0x2] sm:$0x3]  ;;  %v605_v52 = vld [vmem:[%s3052_s1] sm:$0x3]  ;;  %v2273_v61 = vld [vmem:[%s3037_s4 + $0x4] sm:$0xf] }
  0x1f   : > { %2268 = vmatmul.mubr.msk.f32.vlgmr.msra.gmra.mxu0 %vm444_vm0, %v412_v7  ;;  %v633_v50 = vrot.slane %v2272_v48, %v2715_v46  ;;  %v637_v51 = vrot.slane %v2272_v48, %v2717_v47  ;;  %v610_v58 = vrot.slane %v605_v52, %v2715_v46  ;;  %v614_v59 = vrot.slane %v605_v52, %v2717_v47  ;;  %v2280_v62 = vld [vmem:[%s3052_s1 + $0x4] sm:$0x3]  ;;  %v2304_v48 = vld [vmem:[%s3052_s1 + $0xe] sm:$0x3]  ;;  %v2305_v45 = vld [vmem:[%s3037_s4 + $0x1c] sm:$0xf] }
  0x20   : > { %527 = vmatprep.mubr.f32.mxu0 %v2489_v0  ;;  %v819_v6 = vrot.slane %v2280_v62, %v2715_v46  ;;  %v823_v7 = vrot.slane %v2280_v62, %v2717_v47 }
  0x23   : > { %2269 = vmatmul.mubr.msk.f32.gmra.mxu0 %vm444_vm0, %v413_v8  ;;  %v619_v8 = vld [vmem:[%s3037_s4] sm:$0xf] }
  0x24   : > { %533 = vmatprep.mubr.f32.mxu0 %v2489_v0 }
  0x27   : > { %2270 = vmatmul.mubr.msk.f32.gmra.mxu0 %vm444_vm0, %v414_v9  ;;  %v2285_v9 = vld [vmem:[%s3052_s1 + $0x6] sm:$0x3] }
  0x28   : > { %539 = vmatprep.mubr.f32.mxu0 %v2489_v0 }
  0x2b   : > { %2271 = vmatmul.mubr.msk.f32.gmra.mxu0 %vm444_vm0, %v415_v10 }
  0x2c   : > { %1411 = vmatprep.mubr.f32.mxu0 %v2489_v0 }
  0x94   : > { %v437_v15 = vpop.permute.xlu0 %436 }
  0xdf   : > { %v2644_v11 = vpop.f32.mrf.mxu0 }
  0xe1   : > { %v2646_v12 = vpop.f32.mrf.mxu0 }
  0xe3   : > { %v2648_v13 = vpop.f32.mrf.mxu0 }
  0xe5   : > { %v2650_v14 = vpop.f32.mrf.mxu0 }
  0xe7   : > { %v535_v16 = vpop.f32.mrf.mxu0 }
  0xe8   : > { %v536_v17 = vadd.f32 %v535_v16, %v437_v15 }
  0xe9   : > { %v537_v18 = vpop.f32.mrf.mxu0 }
  0xea   : > { %v550_v19 = vmul.f32 0.5, %v536_v17  ;;  %v538_v20 = vadd.f32 %v537_v18, %v437_v15 }
  0xec   : > { %2395 = vtanh.f32 %v550_v19  ;;  %v551_v21 = vmul.f32 0.5, %v538_v20 }
  0xee   : > { %2397 = vtanh.f32 %v551_v21  ;;  %v929_v21 = vrot.slane %v2285_v9, %v2717_v47 }
  0xf9   : > { %v2396_v22 = vpop.eup %2395 }
  0xfa   : > { %v566_v23 = vmul.f32 0.5, %v2396_v22  ;;  %v2281_v22 = vld [vmem:[%s3037_s4 + $0x8] sm:$0xf] }
  0xfb   : > { %v2398_v24 = vpop.eup %2397 }
  0xfc   : > { %v574_v25 = vadd.f32 0.5, %v566_v23  ;;  %v567_v26 = vmul.f32 0.5, %v2398_v24  ;;  %v2294_v23 = vld [vmem:[%s3052_s1 + $0xa] sm:$0x3] }
  0xfe   : > { %v2652_v27 = vmul.f32 %v574_v25, %v536_v17  ;;  %v575_v28 = vadd.f32 0.5, %v567_v26 }
 0x100   : > { %590 = vst [vmem:[#allocation2 + $0x8] sm:$0xff] %v2652_v27  ;;  %v2655_v29 = vmul.f32 %v575_v28, %v538_v20  ;;  %v925_v20 = vrot.slane %v2285_v9, %v2715_v46  ;;  %v541_v9 = vpop.f32.mrf.mxu0 }
 0x102   : > { %591 = vst [vmem:[#allocation2 + $0x20] sm:$0xff] %v2655_v29 }
 0x107   : > { %v2658_v30 = vld [vmem:[#allocation2 + $0x8] sm:$0xf] }
 0x108   : > { %620 = vrot.lane.b32.xlu0 %v2658_v30, %s3046_s26 }
 0x109   : > { %v2662_v31 = vld [vmem:[#allocation2 + $0x20] sm:$0xf] }
 0x10a   : > { %622 = vrot.lane.b32.xlu1 %v2662_v31, %s3046_s26 }
 0x10c   : > { %598 = vrot.lane.b32.xlu0 %v2662_v31, %s2492_s28 }
 0x10e   : > { %596 = vrot.lane.b32.xlu1 %v2658_v30, %s2492_s28  ;;  %s2499_s28 = smov [#allocation3]  }
 0x110   : > { %808 = vrot.lane.b32.xlu0 %v2662_v31, %s2493_s29 }
 0x112   : > { %806 = vrot.lane.b32.xlu1 %v2658_v30, %s2493_s29  ;;  %s404_s29 = sand.u32 1, %s2479_s22  }
 0x114   : > { %914 = vrot.lane.b32.xlu0 %v2662_v31, %s2494_s15 }
 0x116   : > { %912 = vrot.lane.b32.xlu1 %v2658_v30, %s2494_s15  ;;  %s2265_s15 = sshll.u32 %s404_s29, 6 }
 0x118   : > { %1104 = vrot.lane.b32.xlu0 %v2662_v31, %s2495_s16 }
 0x11a   : > { %1102 = vrot.lane.b32.xlu1 %v2658_v30, %s2495_s16  ;;  %s2971_s16 = scalar_lea.vmem [#allocation3], %s2265_s15  ;;  %s2431_s15 = sshll.u32 %s2499_s28, 4  ;;  %s2432_s15 = int_to_ptr.vmem [resolvable:$false] %s2431_s15 }
 0x11b   : > { %s2199_s26 = sshll.u32 %s2971_s16, 4  ;;  %s2987_s26 = int_to_ptr.vmem [resolvable:$true] %s2199_s26 }
 0x11c   : > { %1210 = vrot.lane.b32.xlu0 %v2662_v31, %s2496_s17  ;;  %p2434_p0 = scmp.lt.s32.totalorder %s2987_s26, %s2432_s15 }
 0x11e   : > { %1208 = vrot.lane.b32.xlu1 %v2658_v30, %s2496_s17  ;;  %s2342_s17 = sshll.u32 %s2587_s25, 10  ;;  %s2427_s25 = scalar_lea.vmem %s2987_s26, 1024 }
 0x11f   : > { %s2984_s20 = scalar_lea.hbm %s3045_s12, %s2342_s17  ;;  %p2428_p11 = scmp.ne.s32.totalorder %s2987_s26, %s2427_s25 }
 0x120   : > { %1316 = vrot.lane.b32.xlu0 %v2662_v31, %s2497_s18  ;;  %s2433_s17 = scalar_lea.vmem %s2432_s15, 2048 }
 0x121   : > { %p2429_p12 = pnand %p2428_p11, %p2604_p5  ;;  %p2435_p1 = scmp.lt.s32.totalorder %s2433_s17, %s2427_s25 }
 0x122   : > { %1314 = vrot.lane.b32.xlu1 %v2658_v30, %s2497_s18 }
 0x123   : > { %p2430_p13 = pneg %p2429_p12  ;;  %p2436_p2 = por %p2435_p1, %p2434_p0 }
 0x124   : > { %1422 = vrot.lane.b32.xlu0 %v2662_v31, %s2498_s19 }
 0x125   : > { %p2437_p3 = pnand %p2436_p2, %p2430_p13 }
 0x126   : > { %1420 = vrot.lane.b32.xlu1 %v2658_v30, %s2498_s19  ;;  %s2992_s19 = scalar_lea.sflag [#allocation4], %s404_s29 }
 0x128   : > { %1784 = vperm.xlu0 %2393, %v1766_v32  }
 0x12a   : > { %441 = vperm.xlu1 %2394, %v423_v33  }
 0x12c   : > { %1774 = vperm.xlu0 %2393, %v1764_v34   ;;  %v1119_v34 = vrot.slane %v2294_v23, %v2717_v47 }
 0x12e   : > { %1779 = vperm.xlu1 %2394, %v1765_v35   ;;  %v2286_v35 = vld [vmem:[%s3037_s4 + $0xc] sm:$0xf] }
 0x130   : > { %431 = vperm.xlu0 %2393, %v421_v36   ;;  %v2299_v36 = vld [vmem:[%s3052_s1 + $0xc] sm:$0x3] }
 0x131   : > { %v1225_v43 = vrot.slane %v2299_v36, %v2717_v47 }
 0x132   : > { %1769 = vperm.xlu1 %2394, %v1763_v37  }
 0x134   : > { %2111 = vperm.xlu0 %2393, %v2105_v38   ;;  %v1115_v38 = vrot.slane %v2294_v23, %v2715_v46 }
 0x136   : > { %426 = vperm.xlu1 %2394, %v420_v39  }
 0x138   : > { %2121 = vperm.xlu0 %2393, %v2107_v40  }
 0x13a   : > { %2116 = vperm.xlu1 %2394, %v2106_v41  }
 0x13e   : > { %2126 = vperm.xlu1 %2394, %v2108_v42  }
 0x17a   : > { %v621_v49 = vpop.permute.xlu0 %620 }
 0x17c   : > { %v623_v53 = vpop.permute.xlu1 %622 }
 0x17d   : > { %v625_v54 = vsel %vm624_vm1, %v621_v49, %v623_v53  ;;  %v626_v55 = vsel %vm624_vm1, %v623_v53, %v621_v49 }
 0x17e   : > { %v640_v56 = vmul.f32 %v633_v50, %v626_v55  ;;  %v599_v57 = vpop.permute.xlu0 %598  ;;  %v641_v60 = vmul.f32 %v637_v51, %v625_v54  ;;  %v1221_v50 = vrot.slane %v2299_v36, %v2715_v46  ;;  %v1327_v54 = vrot.slane %v2304_v48, %v2715_v46 }
 0x17f   : > { %v1331_v55 = vrot.slane %v2304_v48, %v2717_v47 }
 0x180   : > { %v597_v63 = vpop.permute.xlu1 %596  ;;  %2274 = vmatprep.subr.msk.mxu1 %vm648_vm3, %v641_v60 }
 0x181   : > { %v603_v1 = vsel %vm602_vm2, %v597_v63, %v599_v57  ;;  %v604_v2 = vsel %vm602_vm2, %v599_v57, %v597_v63  ;;  %2275 = vmatpush1.msk.msra.mxu1 %vm648_vm3, %v640_v56  ;;  %v2295_v56 = vld [vmem:[%s3037_s4 + $0x14] sm:$0xf]  ;;  %v2309_v57 = vld [vmem:[%s3052_s1 + $0x10] sm:$0x3] }
 0x182   : > { %v617_v3 = vmul.f32 %v610_v58, %v604_v2  ;;  %v618_v4 = vmul.f32 %v614_v59, %v603_v1  ;;  %2276 = vmatmul.mubr.msk.f32.vlgmr.msra.gmra.mxu1 %vm644_vm4, %v2273_v61  ;;  %v809_v5 = vpop.permute.xlu0 %808  ;;  %v1433_v1 = vrot.slane %v2309_v57, %v2715_v46  ;;  %v1437_v2 = vrot.slane %v2309_v57, %v2717_v47 }
 0x183   : > { %799 = vmatprep.mubr.f32.mxu1 %v2489_v0 }
 0x184   : > { %v807_v10 = vpop.permute.xlu1 %806  ;;  %2277 = vmatprep.subr.msk.mxu1 %vm648_vm3, %v618_v4 }
 0x185   : > { %v811_v15 = vsel %vm810_vm5, %v807_v10, %v809_v5  ;;  %v812_v16 = vsel %vm810_vm5, %v809_v5, %v807_v10  ;;  %2278 = vmatpush1.msk.msra.mxu1 %vm648_vm3, %v617_v3  ;;  %v2300_v3 = vld [vmem:[%s3037_s4 + $0x18] sm:$0xf] }
 0x186   : > { %v826_v17 = vmul.f32 %v819_v6, %v812_v16  ;;  %v827_v18 = vmul.f32 %v823_v7, %v811_v15  ;;  %2279 = vmatmul.mubr.msk.f32.vlgmr.msra.gmra.mxu1 %vm644_vm4, %v619_v8  ;;  %v915_v19 = vpop.permute.xlu0 %914  ;;  %v2310_v8 = vld [vmem:[%s3037_s4 + $0x20] sm:$0xf]  ;;  %v543_v15 = vpop.f32.mrf.mxu0 }
 0x187   : > { %903 = vmatprep.mubr.f32.mxu1 %v2489_v0 }
 0x188   : > { %v913_v24 = vpop.permute.xlu1 %912  ;;  %2282 = vmatprep.subr.msk.mxu1 %vm648_vm3, %v827_v18 }
 0x189   : > { %v917_v25 = vsel %vm916_vm6, %v913_v24, %v915_v19  ;;  %v918_v26 = vsel %vm916_vm6, %v915_v19, %v913_v24  ;;  %2283 = vmatpush1.msk.msra.mxu1 %vm648_vm3, %v826_v17 }
 0x18a   : > { %v932_v28 = vmul.f32 %v925_v20, %v918_v26  ;;  %v933_v32 = vmul.f32 %v929_v21, %v917_v25  ;;  %2284 = vmatmul.mubr.msk.f32.vlgmr.msra.gmra.mxu1 %vm644_vm4, %v2281_v22  ;;  %v1105_v33 = vpop.permute.xlu0 %1104 }
 0x18b   : > { %1009 = vmatprep.mubr.f32.mxu1 %v2489_v0 }
 0x18c   : > { %v1103_v37 = vpop.permute.xlu1 %1102  ;;  %2287 = vmatprep.subr.msk.mxu1 %vm648_vm3, %v933_v32 }
 0x18d   : > { %v1108_v39 = vsel %vm1106_vm7, %v1105_v33, %v1103_v37  ;;  %2288 = vmatpush1.msk.msra.mxu1 %vm648_vm3, %v932_v28  ;;  %v1107_v40 = vsel %vm1106_vm7, %v1103_v37, %v1105_v33 }
 0x18e   : > { %v1123_v41 = vmul.f32 %v1119_v34, %v1108_v39  ;;  %2289 = vmatmul.mubr.msk.f32.vlgmr.msra.gmra.mxu1 %vm644_vm4, %v2286_v35  ;;  %2291 = vmatprep.subr.msk.mxu1 %vm648_vm3, %v2662_v31  ;;  %v1211_v42 = vpop.permute.xlu0 %1210  ;;  %v1122_v31 = vmul.f32 %v1115_v38, %v1107_v40 }
 0x18f   : > { %2292 = vmatpush1.msk.msra.mxu1 %vm648_vm3, %v2658_v30  ;;  %1093 = vmatprep.mubr.f32.mxu1 %v2489_v0 }
 0x190   : > { %v1209_v49 = vpop.permute.xlu1 %1208  ;;  %2296 = vmatprep.subr.msk.mxu1 %vm648_vm3, %v1123_v41 }
 0x191   : > { %v1214_v51 = vsel %vm1212_vm8, %v1211_v42, %v1209_v49  ;;  %v1213_v30 = vsel %vm1212_vm8, %v1209_v49, %v1211_v42 }
 0x192   : > { %v1229_v52 = vmul.f32 %v1225_v43, %v1214_v51  ;;  %2293 = vmatmul.mubr.msk.f32.vlgmr.msra.gmra.mxu1 %vm644_vm4, %v2290_v44  ;;  %v1317_v53 = vpop.permute.xlu0 %1316  ;;  %v1228_v59 = vmul.f32 %v1221_v50, %v1213_v30  ;;  %v1527_v43 = vld [vmem:[#allocation2 + $0x20] sm:$0xf0] }
 0x193   : > { %2297 = vmatpush1.msk.msra.mxu1 %vm648_vm3, %v1122_v31  ;;  %1199 = vmatprep.mubr.f32.mxu1 %v2489_v0  ;;  %v1526_v31 = vld [vmem:[#allocation2 + $0x8] sm:$0xf0]  ;;  %v1545_v30 = vrot.slane %v1527_v43, 4 }
 0x194   : > { %v1315_v58 = vpop.permute.xlu1 %1314  ;;  %2301 = vmatprep.subr.msk.mxu1 %vm648_vm3, %v1229_v52 }
 0x195   : > { %v1319_v60 = vsel %vm1318_vm9, %v1315_v58, %v1317_v53  ;;  %v1320_v61 = vsel %vm1318_vm9, %v1317_v53, %v1315_v58 }
 0x196   : > { %v1334_v62 = vmul.f32 %v1327_v54, %v1319_v60  ;;  %v1335_v63 = vmul.f32 %v1331_v55, %v1320_v61  ;;  %2298 = vmatmul.mubr.msk.f32.vlgmr.msra.gmra.mxu1 %vm644_vm4, %v2295_v56  ;;  %v1423_v4 = vpop.permute.xlu0 %1422  ;;  %v1542_v55 = vrot.slane %v1526_v31, 4 }
 0x197   : > { %2302 = vmatpush1.msk.msra.mxu1 %vm648_vm3, %v1228_v59  ;;  %1305 = vmatprep.mubr.f32.mxu1 %v2489_v0 }
 0x198   : > { %v1421_v5 = vpop.permute.xlu1 %1420  ;;  %2306 = vmatprep.subr.msk.mxu0 %vm648_vm3, %v1335_v63 }
 0x199   : > { %v1425_v6 = vsel %vm1424_vm10, %v1421_v5, %v1423_v4  ;;  %v1426_v46 = vsel %vm1424_vm10, %v1423_v4, %v1421_v5  ;;  %2307 = vmatpush1.msk.msra.mxu0 %vm648_vm3, %v1334_v62  ;;  %v1535_v4 = vld [vmem:[%s3039_s6 + $0x8] sm:$0xff]  ;;  %v1536_v5 = vld [vmem:[%s3039_s6 + $0x10] sm:$0xff] }
 0x19a   : > { %v1440_v47 = vmul.f32 %v1433_v1, %v1425_v6  ;;  %v1441_v7 = vmul.f32 %v1437_v2, %v1426_v46  ;;  %2303 = vmatmul.mubr.msk.f32.vlgmr.msra.gmra.mxu1 %vm644_vm4, %v2300_v3  ;;  %2308 = vmatmul.mubr.msk.f32.vlgmr.msra.gmra.mxu0 %vm644_vm4, %v2305_v45  ;;  %v1534_v45 = vld [vmem:[%s3039_s6] sm:$0xff]  ;;  %v1537_v6 = vld [vmem:[%s3039_s6 + $0x18] sm:$0xff] }
 0x19b   : > { %1517 = vmatprep.mubr.f32.mxu1 %v2489_v0  ;;  %1631 = vmatprep.mubr.f32.mxu0 %v2489_v0 }
 0x19c   : > { %2311 = vmatprep.subr.msk.mxu1 %vm648_vm3, %v1441_v7 }
 0x19d   : > { %2312 = vmatpush1.msk.msra.mxu1 %vm648_vm3, %v1440_v47 }
 0x19e   : > { %2313 = vmatmul.mubr.msk.f32.vlgmr.msra.gmra.mxu1 %vm644_vm4, %v2310_v8 }
 0x19f   : > { %1738 = vmatprep.mubr.f32.mxu1 %v2489_v0 }
 0x1a3   : > { %v2832_v10 = vpop.permute.xlu0 %1784 }
 0x1a5   : > { %v442_v16 = vpop.permute.xlu1 %441 }
 0x1a6   : > { %v542_v17 = vadd.f32 %v541_v9, %v442_v16  ;;  %v544_v18 = vadd.f32 %v543_v15, %v442_v16 }
 0x1a7   : > { %v2834_v19 = vpop.permute.xlu0 %1774 }
 0x1a8   : > { %v552_v20 = vmul.f32 0.5, %v542_v17  ;;  %v553_v21 = vmul.f32 0.5, %v544_v18 }
 0x1a9   : > { %v2836_v22 = vpop.permute.xlu1 %1779 }
 0x1aa   : > { %2399 = vtanh.f32 %v552_v20 }
 0x1ab   : > { %2401 = vtanh.f32 %v553_v21  ;;  %v432_v23 = vpop.permute.xlu0 %431 }
 0x1ac   : > { %v530_v24 = vadd.f32 %v2648_v13, %v432_v23  ;;  %v532_v25 = vadd.f32 %v2650_v14, %v432_v23 }
 0x1ad   : > { %v2840_v26 = vpop.permute.xlu1 %1769 }
 0x1ae   : > { %v548_v28 = vmul.f32 0.5, %v530_v24  ;;  %v549_v32 = vmul.f32 0.5, %v532_v25 }
 0x1b0   : > { %2403 = vtanh.f32 %v548_v28 }
 0x1b1   : > { %2405 = vtanh.f32 %v549_v32  ;;  %v427_v33 = vpop.permute.xlu1 %426 }
 0x1b2   : > { %v524_v34 = vadd.f32 %v2644_v11, %v427_v33  ;;  %v526_v35 = vadd.f32 %v2646_v12, %v427_v33 }
 0x1b4   : > { %v546_v36 = vmul.f32 0.5, %v524_v34  ;;  %v547_v37 = vmul.f32 0.5, %v526_v35 }
 0x1b6   : > { %2407 = vtanh.f32 %v546_v36 }
 0x1b7   : > { %v2400_v38 = vpop.eup %2399  ;;  %2409 = vtanh.f32 %v547_v37 }
 0x1b8   : > { %v2402_v39 = vpop.eup %2401  ;;  %v568_v13 = vmul.f32 0.5, %v2400_v38 }
 0x1b9   : > { %v569_v40 = vmul.f32 0.5, %v2402_v39 }
 0x1ba   : > { %v576_v14 = vadd.f32 0.5, %v568_v13 }
 0x1bb   : > { %v577_v41 = vadd.f32 0.5, %v569_v40 }
 0x1bc   : > { %v2844_v42 = vmul.f32 %v576_v14, %v542_v17 }
 0x1bd   : > { %v2404_v44 = vpop.eup %2403  ;;  %v2846_v48 = vmul.f32 %v577_v41, %v544_v18 }
 0x1be   : > { %v2406_v49 = vpop.eup %2405  ;;  %v564_v11 = vmul.f32 0.5, %v2404_v44  ;;  %v1543_v12 = vrot.slane %v2844_v42, 4 }
 0x1bf   : > { %v565_v50 = vmul.f32 0.5, %v2406_v49  ;;  %v1546_v51 = vrot.slane %v2846_v48, 4 }
 0x1c0   : > { %v572_v52 = vadd.f32 0.5, %v564_v11  ;;  %v1544_v59 = vsel %vm648_vm3, %v1542_v55, %v1543_v12 }
 0x1c1   : > { %v573_v53 = vadd.f32 0.5, %v565_v50  ;;  %2314 = vmatprep.subr.msk.mxu0 %vm648_vm3, %v1546_v51  ;;  %v1547_v54 = vsel %vm648_vm3, %v1545_v30, %v1546_v51  ;;  %v1530_v51 = vld [vmem:[%s3038_s5] sm:$0xff]  ;;  %v1531_v30 = vld [vmem:[%s3038_s5 + $0x8] sm:$0xff] }
 0x1c2   : > { %v2852_v56 = vmul.f32 %v572_v52, %v530_v24  ;;  %2315 = vmatpush1.msk.msra.mxu0 %vm648_vm3, %v1543_v12  ;;  %v1532_v52 = vld [vmem:[%s3038_s5 + $0x10] sm:$0xff] }
 0x1c3   : > { %v2408_v57 = vpop.eup %2407  ;;  %v2855_v58 = vmul.f32 %v573_v53, %v532_v25  ;;  %1597 = vmatprep.subr.mxu0 %v1547_v54  ;;  %v1533_v53 = vld [vmem:[%s3038_s5 + $0x18] sm:$0xff] }
 0x1c4   : > { %v2410_v60 = vpop.eup %2409  ;;  %v562_v61 = vmul.f32 0.5, %v2408_v57  ;;  %1598 = vmatpush1.msra.mxu0 %v1544_v59 }
 0x1c5   : > { %v563_v62 = vmul.f32 0.5, %v2410_v60  ;;  %2316 = vmatmul.mubr.msk.f32.vlgmr.msra.gmra.mxu0 %vm1550_vm11, %v1534_v45 }
 0x1c6   : > { %v570_v63 = vadd.f32 0.5, %v562_v61  ;;  %1637 = vmatprep.mubr.f32.mxu0 %v2489_v0 }
 0x1c7   : > { %v571_v1 = vadd.f32 0.5, %v563_v62 }
 0x1c8   : > { %v2858_v2 = vmul.f32 %v570_v63, %v524_v34 }
 0x1c9   : > { %v2860_v3 = vmul.f32 %v571_v1, %v526_v35  ;;  %2317 = vmatmul.mubr.msk.f32.gmra.mxu0 %vm1550_vm11, %v1535_v4 }
 0x1ca   : > { %1643 = vmatprep.mubr.f32.mxu0 %v2489_v0 }
 0x1cd   : > { %2318 = vmatmul.mubr.msk.f32.gmra.mxu0 %vm1550_vm11, %v1536_v5 }
 0x1ce   : > { %1649 = vmatprep.mubr.f32.mxu0 %v2489_v0 }
 0x1d1   : > { %2319 = vmatmul.mubr.msk.f32.gmra.mxu0 %vm1550_vm11, %v1537_v6 }
 0x1d2   : > { %1878 = vmatprep.mubr.f32.mxu0 %v2489_v0 }
 0x242   : > { %v721_v46 = vpop.f32.mrf.mxu1 }
 0x244   : > { %v723_v47 = vpop.f32.mrf.mxu1 }
 0x246   : > { %v801_v7 = vpop.f32.mrf.mxu1 }
 0x247   : > { %v802_v18 = vadd.f32 %v801_v7, %v721_v46 }
 0x248   : > { %v803_v8 = vpop.f32.mrf.mxu1 }
 0x249   : > { %v804_v21 = vadd.f32 %v803_v8, %v723_v47 }
 0x24a   : > { %v905_v9 = vpop.f32.mrf.mxu1 }
 0x24b   : > { %v910_v23 = vadd.f32 %v905_v9, %v802_v18 }
 0x24c   : > { %v907_v15 = vpop.f32.mrf.mxu1 }
 0x24d   : > { %v911_v25 = vadd.f32 %v907_v15, %v804_v21 }
 0x24e   : > { %v1011_v16 = vpop.f32.mrf.mxu1 }
 0x24f   : > { %v1016_v28 = vadd.f32 %v1011_v16, %v910_v23 }
 0x250   : > { %v1013_v17 = vpop.f32.mrf.mxu1 }
 0x251   : > { %v1017_v33 = vadd.f32 %v1013_v17, %v911_v25 }
 0x252   : > { %v1095_v20 = vpop.f32.mrf.mxu1 }
 0x253   : > { %v1100_v34 = vadd.f32 %v1095_v20, %v1016_v28 }
 0x254   : > { %v1097_v24 = vpop.f32.mrf.mxu1 }
 0x255   : > { %v1101_v36 = vadd.f32 %v1097_v24, %v1017_v33 }
 0x256   : > { %v1201_v32 = vpop.f32.mrf.mxu1 }
 0x257   : > { %v1206_v37 = vadd.f32 %v1201_v32, %v1100_v34 }
 0x258   : > { %v1203_v35 = vpop.f32.mrf.mxu1 }
 0x259   : > { %v1207_v13 = vadd.f32 %v1203_v35, %v1101_v36 }
 0x25a   : > { %v1307_v38 = vpop.f32.mrf.mxu1  ;;  %v1413_v39 = vpop.f32.mrf.mxu0 }
 0x25b   : > { %v1312_v40 = vadd.f32 %v1307_v38, %v1206_v37 }
 0x25c   : > { %v1309_v14 = vpop.f32.mrf.mxu1  ;;  %v1415_v44 = vpop.f32.mrf.mxu0 }
 0x25d   : > { %v1313_v41 = vadd.f32 %v1309_v14, %v1207_v13  ;;  %v1418_v43 = vadd.f32 %v1413_v39, %v1312_v40  ;;  %v1891_v14 = vld [vmem:[%s3042_s9] sm:$0xff] }
 0x25e   : > { %v1519_v49 = vpop.f32.mrf.mxu1 }
 0x25f   : > { %v1419_v11 = vadd.f32 %v1415_v44, %v1313_v41  ;;  %v1524_v50 = vadd.f32 %v1519_v49, %v1418_v43 }
 0x260   : > { %v1521_v12 = vpop.f32.mrf.mxu1 }
 0x261   : > { %v1525_v31 = vadd.f32 %v1521_v12, %v1419_v11 }
 0x263   : > { %2320 = vmatprep.subr.msk.mxu1 %vm648_vm3, %v1525_v31 }
 0x264   : > { %2321 = vmatpush1.msk.msra.mxu1 %vm648_vm3, %v1524_v50  ;;  %v1899_v50 = vld [vmem:[%s3043_s10] sm:$0xff] }
 0x265   : > { %2322 = vmatmul.mubr.msk.f32.vlgmr.msra.gmra.mxu1 %vm644_vm4, %v1530_v51 }
 0x266   : > { %1744 = vmatprep.mubr.f32.mxu1 %v2489_v0 }
 0x269   : > { %2323 = vmatmul.mubr.msk.f32.gmra.mxu1 %vm644_vm4, %v1531_v30 }
 0x26a   : > { %1750 = vmatprep.mubr.f32.mxu1 %v2489_v0 }
 0x26d   : > { %2324 = vmatmul.mubr.msk.f32.gmra.mxu1 %vm644_vm4, %v1532_v52 }
 0x26e   : > { %1756 = vmatprep.mubr.f32.mxu1 %v2489_v0 }
 0x271   : > { %2325 = vmatmul.mubr.msk.f32.gmra.mxu1 %vm644_vm4, %v1533_v53 }
 0x272   : > { %1979 = vmatprep.mubr.f32.mxu1 %v2489_v0 }
 0x285   : > { %v1633_v54 = vpop.f32.mrf.mxu0 }
 0x287   : > { %v1635_v55 = vpop.f32.mrf.mxu0 }
 0x289   : > { %v1639_v57 = vpop.f32.mrf.mxu0 }
 0x28b   : > { %v1641_v59 = vpop.f32.mrf.mxu0 }
 0x28d   : > { %v1645_v62 = vpop.f32.mrf.mxu0 }
 0x28f   : > { %v1647_v45 = vpop.f32.mrf.mxu0 }
 0x291   : > { %v1651_v5 = vpop.f32.mrf.mxu0 }
 0x293   : > { %v1653_v9 = vpop.f32.mrf.mxu0 }
 0x325   : > { %v1740_v60 = vpop.f32.mrf.mxu1 }
 0x326   : > { %v1741_v25 = vadd.f32 %v1740_v60, %v1633_v54  ;;  %v2112_v54 = vpop.permute.xlu0 %2111 }
 0x327   : > { %v1742_v61 = vpop.f32.mrf.mxu1 }
 0x328   : > { %v1743_v21 = vadd.f32 %v1742_v61, %v1635_v55  ;;  %v1787_v38 = vadd.f32 %v2840_v26, %v1741_v25 }
 0x329   : > { %v1746_v63 = vpop.f32.mrf.mxu1 }
 0x32a   : > { %v1747_v18 = vadd.f32 %v1746_v63, %v1639_v57  ;;  %v1788_v36 = vadd.f32 %v2840_v26, %v1743_v21  ;;  %v1804_v26 = vld [vmem:[%s3041_s8 + $0x8] sm:$0xff]  ;;  %v2117_v63 = vpop.permute.xlu1 %2116 }
 0x32b   : > { %v1748_v1 = vpop.f32.mrf.mxu1 }
 0x32c   : > { %v1749_v16 = vadd.f32 %v1748_v1, %v1641_v59  ;;  %v1789_v34 = vadd.f32 %v2834_v19, %v1747_v18  ;;  %v1796_v40 = vmax.f32 %v1788_v36, 0.0 }
 0x32d   : > { %v1752_v4 = vpop.f32.mrf.mxu1 }
 0x32e   : > { %v1753_v8 = vadd.f32 %v1752_v4, %v1645_v62  ;;  %v1790_v32 = vadd.f32 %v2834_v19, %v1749_v16  ;;  %v1803_v19 = vld [vmem:[%s3041_s8] sm:$0xff]  ;;  %v2127_v25 = vpop.permute.xlu1 %2126 }
 0x32f   : > { %v1754_v6 = vpop.f32.mrf.mxu1 }
 0x330   : > { %v1755_v47 = vadd.f32 %v1754_v6, %v1647_v45  ;;  %v1791_v28 = vadd.f32 %v2836_v22, %v1753_v8  ;;  %v1798_v13 = vmax.f32 %v1790_v32, 0.0  ;;  %v2122_v8 = vpop.permute.xlu0 %2121 }
 0x331   : > { %v1758_v46 = vpop.f32.mrf.mxu1 }
 0x332   : > { %v1759_v7 = vadd.f32 %v1758_v46, %v1651_v5  ;;  %v1792_v23 = vadd.f32 %v2836_v22, %v1755_v47  ;;  %v1799_v39 = vmax.f32 %v1791_v28, 0.0  ;;  %v1795_v22 = vmax.f32 %v1787_v38, 0.0 }
 0x333   : > { %v1760_v15 = vpop.f32.mrf.mxu1 }
 0x334   : > { %v1761_v17 = vadd.f32 %v1760_v15, %v1653_v9  ;;  %v1793_v20 = vadd.f32 %v2832_v10, %v1759_v7  ;;  %v1800_v37 = vmax.f32 %v1792_v23, 0.0 }
 0x336   : > { %v1794_v24 = vadd.f32 %v2832_v10, %v1761_v17  ;;  %v1801_v35 = vmax.f32 %v1793_v20, 0.0  ;;  %v1797_v10 = vmax.f32 %v1789_v34, 0.0 }
 0x338   : > { %v1802_v33 = vmax.f32 %v1794_v24, 0.0 }
 0x33a   : > { %1838 = vmatprep.subr.mxu0 %v1802_v33 }
 0x33b   : > { %1839 = vmatpush1.msra.mxu0 %v1801_v35 }
 0x33c   : > { %1840 = vmatprep.subr.mxu0 %v1800_v37 }
 0x33d   : > { %1841 = vmatpush1.msra.mxu0 %v1799_v39 }
 0x33e   : > { %1842 = vmatprep.subr.mxu0 %v1798_v13 }
 0x33f   : > { %1843 = vmatpush1.msra.mxu0 %v1797_v10 }
 0x340   : > { %1844 = vmatprep.subr.mxu0 %v1796_v40 }
 0x341   : > { %1845 = vmatpush1.msra.mxu0 %v1795_v22 }
 0x342   : > { %2326 = vmatmul.mubr.msk.f32.vlgmr.msra.gmra.mxu0 %vm1807_vm12, %v1803_v19  ;;  %2040 = vmatprep.subr.mxu0 %v2846_v48 }
 0x343   : > { %2041 = vmatpush1.msra.mxu0 %v2844_v42  ;;  %1884 = vmatprep.mubr.f32.mxu0 %v2489_v0 }
 0x344   : > { %2042 = vmatprep.subr.mxu0 %v2655_v29 }
 0x345   : > { %2043 = vmatpush1.msra.mxu0 %v2652_v27 }
 0x346   : > { %2327 = vmatmul.mubr.msk.f32.gmra.mxu0 %vm1807_vm12, %v1804_v26  ;;  %2044 = vmatprep.subr.mxu0 %v2855_v58  ;;  %v1892_v58 = vld [vmem:[%s3042_s9 + $0x8] sm:$0xff] }
 0x347   : > { %2045 = vmatpush1.msra.mxu0 %v2852_v56  ;;  %2080 = vmatprep.mubr.f32.mxu0 %v2489_v0  ;;  %v1893_v56 = vld [vmem:[%s3042_s9 + $0x10] sm:$0xff] }
 0x348   : > { %2046 = vmatprep.subr.mxu0 %v2860_v3 }
 0x349   : > { %2047 = vmatpush1.msra.mxu0 %v2858_v2  ;;  %v1894_v2 = vld [vmem:[%s3042_s9 + $0x18] sm:$0xff] }
 0x34a   : > { %2332 = vmatmul.mubr.msk.f32.vlgmr.msra.gmra.mxu0 %vm1807_vm12, %v1891_v14 }
 0x34b   : > { %2086 = vmatprep.mubr.f32.mxu0 %v2489_v0 }
 0x34e   : > { %2333 = vmatmul.mubr.msk.f32.gmra.mxu0 %vm1807_vm12, %v1892_v58 }
 0x34f   : > { %2092 = vmatprep.mubr.f32.mxu0 %v2489_v0 }
 0x352   : > { %2334 = vmatmul.mubr.msk.f32.gmra.mxu0 %vm1807_vm12, %v1893_v56 }
 0x353   : > { %2098 = vmatprep.mubr.f32.mxu0 %v2489_v0 }
 0x356   : > { %2335 = vmatmul.mubr.msk.f32.gmra.mxu0 %vm1807_vm12, %v1894_v2 }
 0x402   : > { %v1880_v3 = vpop.f32.mrf.mxu0 }
 0x403   : > { %v1881_v31 = vadd.f32 %v1880_v3, %v2652_v27  ;;  %v1901_v27 = vld [vmem:[%s3043_s10 + $0x10] sm:$0xff] }
 0x404   : > { %v1882_v41 = vpop.f32.mrf.mxu0 }
 0x405   : > { %v1883_v12 = vadd.f32 %v1882_v41, %v2655_v29  ;;  %v1902_v29 = vld [vmem:[%s3043_s10 + $0x18] sm:$0xff] }
 0x406   : > { %v1886_v43 = vpop.f32.mrf.mxu0 }
 0x407   : > { %v1887_v11 = vadd.f32 %v1886_v43, %v2844_v42  ;;  %v1900_v42 = vld [vmem:[%s3043_s10 + $0x8] sm:$0xff] }
 0x408   : > { %v1888_v44 = vpop.f32.mrf.mxu0 }
 0x409   : > { %v1889_v49 = vadd.f32 %v1888_v44, %v2846_v48 }
 0x40a   : > { %v2082_v48 = vpop.f32.mrf.mxu0 }
 0x40b   : > { %1943 = vmatprep.subr.mxu1 %v1889_v49 }
 0x40c   : > { %1944 = vmatpush1.msra.mxu1 %v1887_v11  ;;  %v2084_v51 = vpop.f32.mrf.mxu0 }
 0x40d   : > { %1945 = vmatprep.subr.mxu1 %v1883_v12 }
 0x40e   : > { %1946 = vmatpush1.msra.mxu1 %v1881_v31  ;;  %v2088_v30 = vpop.f32.mrf.mxu0 }
 0x40f   : > { %2328 = vmatmul.mubr.msk.f32.vlgmr.msra.gmra.mxu1 %vm444_vm0, %v1899_v50 }
 0x410   : > { %1985 = vmatprep.mubr.f32.mxu1 %v2489_v0  ;;  %v2090_v52 = vpop.f32.mrf.mxu0 }
 0x412   : > { %v2094_v59 = vpop.f32.mrf.mxu0 }
 0x413   : > { %2329 = vmatmul.mubr.msk.f32.gmra.mxu1 %vm444_vm0, %v1900_v42 }
 0x414   : > { %1991 = vmatprep.mubr.f32.mxu1 %v2489_v0  ;;  %v2096_v5 = vpop.f32.mrf.mxu0 }
 0x416   : > { %v2100_v18 = vpop.f32.mrf.mxu0 }
 0x417   : > { %2330 = vmatmul.mubr.msk.f32.gmra.mxu1 %vm444_vm0, %v1901_v27 }
 0x418   : > { %1997 = vmatprep.mubr.f32.mxu1 %v2489_v0  ;;  %v2102_v35 = vpop.f32.mrf.mxu0 }
 0x41b   : > { %2331 = vmatmul.mubr.msk.f32.gmra.mxu1 %vm444_vm0, %v1902_v29 }
 0x4cf   : > { %v1981_v53 = vpop.f32.mrf.mxu1 }
 0x4d0   : > { %v2083_v55 = vadd.f32 %v2082_v48, %v1981_v53 }
 0x4d1   : > { %v1983_v57 = vpop.f32.mrf.mxu1 }
 0x4d2   : > { %v2129_v60 = vadd.f32 %v2112_v54, %v2083_v55  ;;  %v2085_v61 = vadd.f32 %v2084_v51, %v1983_v57 }
 0x4d3   : > { %v1987_v62 = vpop.f32.mrf.mxu1 }
 0x4d4   : > { %v2137_v0 = vmul.f32 0.5, %v2129_v60  ;;  %v2130_v1 = vadd.f32 %v2112_v54, %v2085_v61  ;;  %v2089_v45 = vadd.f32 %v2088_v30, %v1987_v62 }
 0x4d5   : > { %v1989_v4 = vpop.f32.mrf.mxu1 }
 0x4d6   : > { %2411 = vtanh.f32 %v2137_v0  ;;  %v2138_v6 = vmul.f32 0.5, %v2130_v1  ;;  %v2131_v46 = vadd.f32 %v2117_v63, %v2089_v45  ;;  %v2091_v47 = vadd.f32 %v2090_v52, %v1989_v4 }
 0x4d7   : > { %v1993_v7 = vpop.f32.mrf.mxu1 }
 0x4d8   : > { %2413 = vtanh.f32 %v2138_v6  ;;  %v2139_v9 = vmul.f32 0.5, %v2131_v46  ;;  %v2132_v15 = vadd.f32 %v2117_v63, %v2091_v47  ;;  %v2095_v16 = vadd.f32 %v2094_v59, %v1993_v7 }
 0x4d9   : > { %v1995_v17 = vpop.f32.mrf.mxu1 }
 0x4da   : > { %2415 = vtanh.f32 %v2139_v9  ;;  %v2140_v20 = vmul.f32 0.5, %v2132_v15  ;;  %v2133_v21 = vadd.f32 %v2122_v8, %v2095_v16  ;;  %v2097_v23 = vadd.f32 %v2096_v5, %v1995_v17 }
 0x4db   : > { %v1999_v24 = vpop.f32.mrf.mxu1 }
 0x4dc   : > { %2417 = vtanh.f32 %v2140_v20  ;;  %v2141_v28 = vmul.f32 0.5, %v2133_v21  ;;  %v2134_v32 = vadd.f32 %v2122_v8, %v2097_v23  ;;  %v2101_v33 = vadd.f32 %v2100_v18, %v1999_v24 }
 0x4dd   : > { %v2001_v34 = vpop.f32.mrf.mxu1 }
 0x4de   : > { %2419 = vtanh.f32 %v2141_v28  ;;  %v2142_v36 = vmul.f32 0.5, %v2134_v32  ;;  %v2135_v37 = vadd.f32 %v2127_v25, %v2101_v33  ;;  %v2103_v38 = vadd.f32 %v2102_v35, %v2001_v34 }
 0x4e0   : > { %2421 = vtanh.f32 %v2142_v36  ;;  %v2143_v39 = vmul.f32 0.5, %v2135_v37  ;;  %v2136_v13 = vadd.f32 %v2127_v25, %v2103_v38 }
 0x4e2   : > { %2423 = vtanh.f32 %v2143_v39  ;;  %v2144_v10 = vmul.f32 0.5, %v2136_v13 }
 0x4e3   : > { %v2412_v40 = vpop.eup %2411 }
 0x4e4   : > { %v2153_v22 = vmul.f32 0.5, %v2412_v40  ;;  %2425 = vtanh.f32 %v2144_v10 }
 0x4e5   : > { %v2414_v19 = vpop.eup %2413 }
 0x4e6   : > { %v2161_v26 = vadd.f32 0.5, %v2153_v22  ;;  %v2154_v14 = vmul.f32 0.5, %v2414_v19 }
 0x4e7   : > { %v2416_v58 = vpop.eup %2415 }
 0x4e8   : > { %v2169_v56 = vmul.f32 %v2161_v26, %v2129_v60  ;;  %v2162_v2 = vadd.f32 0.5, %v2154_v14  ;;  %v2155_v3 = vmul.f32 0.5, %v2416_v58 }
 0x4e9   : > { %v2418_v41 = vpop.eup %2417 }
 0x4ea   : > { %2177 = vst [vmem:[%s2971_s16] sm:$0xff] %v2169_v56  ;;  %v2170_v43 = vmul.f32 %v2162_v2, %v2130_v1  ;;  %v2163_v44 = vadd.f32 0.5, %v2155_v3  ;;  %v2156_v49 = vmul.f32 0.5, %v2418_v41 }
 0x4eb   : > { %v2420_v11 = vpop.eup %2419 }
 0x4ec   : > { %2178 = vst [vmem:[%s2971_s16 + $0x8] sm:$0xff] %v2170_v43  ;;  %v2171_v12 = vmul.f32 %v2163_v44, %v2131_v46  ;;  %v2164_v31 = vadd.f32 0.5, %v2156_v49  ;;  %v2157_v50 = vmul.f32 0.5, %v2420_v11 }
 0x4ed   : > { %v2422_v42 = vpop.eup %2421 }
 0x4ee   : > { %2179 = vst [vmem:[%s2971_s16 + $0x10] sm:$0xff] %v2171_v12  ;;  %v2172_v27 = vmul.f32 %v2164_v31, %v2132_v15  ;;  %v2165_v29 = vadd.f32 0.5, %v2157_v50  ;;  %v2158_v48 = vmul.f32 0.5, %v2422_v42 }
 0x4ef   : > { %v2424_v51 = vpop.eup %2423 }
 0x4f0   : > { %2180 = vst [vmem:[%s2971_s16 + $0x18] sm:$0xff] %v2172_v27  ;;  %v2173_v30 = vmul.f32 %v2165_v29, %v2133_v21  ;;  %v2166_v52 = vadd.f32 0.5, %v2158_v48  ;;  %v2159_v53 = vmul.f32 0.5, %v2424_v51 }
 0x4f1   : > { %v2426_v54 = vpop.eup %2425 }
 0x4f2   : > { %2181 = vst [vmem:[%s2971_s16 + $0x20] sm:$0xff] %v2173_v30  ;;  %v2174_v55 = vmul.f32 %v2166_v52, %v2134_v32  ;;  %v2167_v57 = vadd.f32 0.5, %v2159_v53  ;;  %v2160_v59 = vmul.f32 0.5, %v2426_v54 }
 0x4f4   : > { %2182 = vst [vmem:[%s2971_s16 + $0x28] sm:$0xff] %v2174_v55  ;;  %v2175_v60 = vmul.f32 %v2167_v57, %v2135_v37  ;;  %v2168_v61 = vadd.f32 0.5, %v2160_v59 }
 0x4f6   : > { %2183 = vst [vmem:[%s2971_s16 + $0x30] sm:$0xff] %v2175_v60  ;;  %v2176_v62 = vmul.f32 %v2168_v61, %v2136_v13 }
 0x4f8   : > { %2184 = vst [vmem:[%s2971_s16 + $0x38] sm:$0xff] %v2176_v62 }
 0x4f9   : > { %2440 = shalt.err (!%p2437_p3)
}
 0x4fa   : > { %s2441_s29 = scalar_lea.hbm %s2984_s20, 1024  ;;  %s2445_s0 = scalar_lea.hbm %s3045_s12, 2048 }
 0x4fb   : > { %p2442_p4 = scmp.ne.s32.totalorder %s2984_s20, %s2441_s29  ;;  %p2446_p9 = scmp.lt.s32.totalorder %s2984_s20, %s3045_s12 }
 0x4fc   : > { %p2447_p10 = scmp.lt.s32.totalorder %s2445_s0, %s2441_s29 }
 0x4fd   : > { %p2443_p7 = pnand %p2442_p4, %p2604_p5 }
 0x4fe   : > { %p2448_p11 = por %p2447_p10, %p2446_p9 }
 0x4ff   : > { %p2444_p8 = pneg %p2443_p7 }
 0x501   : > { %p2449_p12 = pnand %p2448_p11, %p2444_p8 }
 0x503   : > { %2452 = shalt.err (!%p2449_p12)
}
 0x504   : > { %s2500_s25 = smov 256   ;;  %s3053_s15 = smov 16  }
 0x505   : > { %2343 = dma.vmem_to_hbm [thread:$0]  (%p2604_p5), %s2987_s26, 1024, %s2984_s20, %s2992_s19, %s2500_s25, %s2500_s25, %s3053_s15  }
 0x506 PF: > { %p2349_p13 = scmp.ge.s32.totalorder %s2487_s24, 2  ;;  %s2214_s17 = sand.u32 1, %s2475_s21  }
 0x507   : > { %s2215_s1 = scalar_lea.sflag [#allocation4], %s2214_s17 }
 0x508   : > { %p2346_p0 = pnand %p2349_p13, %p2608_p6 }
 0x50a   : > { %p2347_p1 = pneg %p2346_p0 }
 0x50c   : > { %2470 = dma.done.wait (%p2347_p1), %s2215_s1, 1024  }
 0x50d   : > { %2472 = vsyncadd (%p2347_p1), %s2215_s1, 4294966272  ;;  %p22_p2 = scmp.ge.s32.totalorder %s2591_s27, 4   ;;  %s3054_s21 = smov %s2479_s22 }
 0x50e   : > { %s3055_s22 = smov %s2483_s23  ;;  %s3056_s23 = smov %s2602_s30 }
 0x50f   : > { %s3057_s24 = smov %s2591_s27  ;;  %24 = sbr.rel (!%p22_p2) target bundleno = 6 (0x6), region = 118 }
 0x514   :  { %2220 = vsyncpa [#allocation4], 1 }
 0x515   :  { %2222 = vsyncpa [#allocation4 + $0x1], 1 }

</bundles_post_ra>
